<compile_context>
chip_gen: v6e
topology: v6e:2x2x1
jax: 0.10.0
libtpu: 0.0.40
codegen_flags: <defaults>
</compile_context>

<pallas_src>
import functools

import jax
import jax.numpy as jnp
from jax.experimental import pallas as pl
from jax.experimental.pallas import tpu as pltpu

EPS = 1e-5  # torch.nn.BatchNorm2d default eps


# ------------------------------ Pallas kernel --------------------------------
def _resblk_kernel(xpad_ref, w1s_ref, w2_ref, bnp_ref, o_ref, h1pad_ref,
                   *, n, h, w, cin, cout, has_proj):
    mr = n * h                 # rows of the lane-dense slab
    lanes = w * cout           # 128 at the demo shapes -> unmasked stores
    wcin = w * cin
    inv_m = 1.0 / float(n * h * w)   # BN population (train-mode batch stats)

    # 0/1 fold (lane -> channel, channel = lane % cout) and unfold matrices,
    # generated in-kernel from iota: saves two input DMAs.
    fold = (jax.lax.broadcasted_iota(jnp.int32, (lanes, cout), 0) % cout ==
            jax.lax.broadcasted_iota(jnp.int32, (lanes, cout), 1)
            ).astype(jnp.float32)                                  # (lanes, cout)
    unfold = (jax.lax.broadcasted_iota(jnp.int32, (cout, lanes), 0) ==
              jax.lax.broadcasted_iota(jnp.int32, (cout, lanes), 1) % cout
              ).astype(jnp.float32)                                # (cout, lanes)

    bnp = bnp_ref[...]                                             # (8, cout) f32

    def batchnorm(y, idx, relu, out_dtype):
        # y: (mr, lanes) f32.  One-pass sum / sum-of-squares; fold to per-channel
        # stats and broadcast back with tiny MXU dots so the elementwise work
        # stays lane-dense.  Single fused scale*y + shift epilogue.
        gamma = bnp[2 * idx:2 * idx + 1, :]                        # (1, cout)
        beta = bnp[2 * idx + 1:2 * idx + 2, :]
        colsum = jnp.sum(y, axis=0, keepdims=True)                 # (1, lanes)
        colsq = jnp.sum(y * y, axis=0, keepdims=True)              # (1, lanes)
        stats = jnp.dot(jnp.concatenate([colsum, colsq], axis=0), fold,
                        preferred_element_type=jnp.float32)        # (2, cout)
        mean = stats[0:1, :] * inv_m
        var = jnp.maximum(stats[1:2, :] * inv_m - mean * mean, 0.0)  # clamp >= 0
        scale = gamma * jax.lax.rsqrt(var + EPS)                   # (1, cout)
        shift = beta - mean * scale
        ss = jnp.dot(jnp.concatenate([scale, shift], axis=0), unfold,
                     preferred_element_type=jnp.float32)           # (2, lanes)
        out = y * ss[0:1, :] + ss[1:2, :]
        if relu:
            out = jnp.maximum(out, 0.0)
        return out.astype(out_dtype)

    # ---- conv1 (3x3, pad 1) + 1x1 shortcut projection: ONE fused MXU dot ----
    # Operand: three ky-shifted row windows of the H-padded bf16 slab placed
    # side by side along K.  Weights: [banded 3x3 | K-padded block-diag 1x1]
    # along the output lanes -> (mr, 2*lanes) result in a single pass.
    xp = xpad_ref[...]                                             # (n, h+2, wcin) bf16
    xop = jnp.concatenate([xp[:, ky:ky + h, :] for ky in range(3)],
                          axis=-1).reshape(mr, 3 * wcin)           # (mr, 3*wcin) bf16
    out1 = jnp.dot(xop, w1s_ref[...], preferred_element_type=jnp.float32)
    h1 = batchnorm(out1[:, :lanes], 0, relu=True, out_dtype=jnp.bfloat16)

    # ---- conv2 (3x3, pad 1): h1 goes into a zero-bordered VMEM scratch ref;
    # ky windows are read back as ref views (no value-level concat of h1p).
    h1pad_ref[...] = jnp.zeros_like(h1pad_ref)
    h1pad_ref[:, 1:1 + h, :] = h1.reshape(n, h, lanes)
    h1op = jnp.concatenate([h1pad_ref[:, ky:ky + h, :] for ky in range(3)],
                           axis=-1).reshape(mr, 3 * lanes)         # (mr, 3*lanes) bf16
    acc2 = jnp.dot(h1op, w2_ref[...], preferred_element_type=jnp.float32)
    y2 = batchnorm(acc2, 1, relu=False, out_dtype=jnp.float32)

    # ---- shortcut BN (projection already computed in out1) + residual add ---
    if has_proj:
        shortcut = batchnorm(out1[:, lanes:2 * lanes], 2, relu=False,
                             out_dtype=jnp.float32)
    else:
        # Identity path: interior rows of x (bf16 slab -> tiny rounding only).
        shortcut = xop[:, wcin:2 * wcin].astype(jnp.float32)

    o_ref[...] = y2 + shortcut


# ------------------------- weight re-layout (JAX glue) ------------------------
def _band_conv3_weights(wt, width):
    """(3, 3, Cin, Cout) HWIO -> (3*W*Cin, W*Cout): banded matrices (W taps and
    W zero-padding folded in), the 3 ky blocks stacked along K so the kernel
    needs a single MXU dot per conv."""
    kh, kw, cin, cout = wt.shape
    out = jnp.zeros((kh, width * cin, width * cout), wt.dtype)
    for ky in range(kh):
        for kx in range(kw):
            for xo in range(width):
                xi = xo + kx - 1  # padded-by-1 conv
                if 0 <= xi < width:
                    out = out.at[ky, xi * cin:(xi + 1) * cin,
                                 xo * cout:(xo + 1) * cout].set(wt[ky, kx])
    return out.reshape(kh * width * cin, width * cout)


def _blockdiag_1x1_weights(ws, width):
    """(Cin, Cout) -> (W*Cin, W*Cout) block-diagonal (1x1 conv in packed layout)."""
    cin, cout = ws.shape
    out = jnp.zeros((width * cin, width * cout), ws.dtype)
    for xo in range(width):
        out = out.at[xo * cin:(xo + 1) * cin, xo * cout:(xo + 1) * cout].set(ws)
    return out


# ------------------------------ wrapper ---------------------------------------
def resblk_forward(x_nchw, params, ch_in, ch_out):
    N, Cin, H, W = x_nchw.shape
    assert Cin == ch_in
    lanes = W * ch_out
    wcin = W * ch_in
    mr = N * H
    has_proj = ch_in != ch_out

    # NHWC, zero-pad H only (W padding is folded into the banded weights),
    # flatten (W, Cin) onto the lane dim, cast to bf16 ONCE (half the DMA).
    x = jnp.transpose(x_nchw, (0, 2, 3, 1)).astype(jnp.float32)
    xpad = jnp.pad(x, ((0, 0), (1, 1), (0, 0), (0, 0))) \
              .reshape(N, H + 2, wcin).astype(jnp.bfloat16)

    # conv1 banded weights, with the 1x1 shortcut projection (K-padded to the
    # ky=1 rows) concatenated along the OUTPUT lanes -> one 256-wide dot.
    w1cat = _band_conv3_weights(params["w1"], W)                   # (3*wcin, lanes)
    if has_proj:
        ws_blk = _blockdiag_1x1_weights(params["ws"], W)           # (wcin, lanes)
        ws_pad = jnp.zeros((3 * wcin, lanes), ws_blk.dtype
                           ).at[wcin:2 * wcin, :].set(ws_blk)
        w1s = jnp.concatenate([w1cat, ws_pad], axis=1)             # (3*wcin, 2*lanes)
    else:
        w1s = w1cat
    w1s = w1s.astype(jnp.bfloat16)
    w2cat = _band_conv3_weights(params["w2"], W).astype(jnp.bfloat16)  # (3*lanes, lanes)

    # Pack the (up to 6) tiny BN param rows into ONE small array (one DMA).
    rows = [params["g1"], params["be1"], params["g2"], params["be2"]]
    if has_proj:
        rows += [params["gs"], params["bes"]]
    rows += [jnp.zeros((1, ch_out), jnp.float32)] * (8 - len(rows))
    bnp = jnp.concatenate(rows, axis=0)                            # (8, ch_out)

    inputs = [xpad, w1s, w2cat, bnp]

    def full(a):
        nd = a.ndim
        return pl.BlockSpec(a.shape, lambda i, _nd=nd: (0,) * _nd)

    out2d = pl.pallas_call(
        functools.partial(_resblk_kernel, n=N, h=H, w=W,
                          cin=ch_in, cout=ch_out, has_proj=has_proj),
        out_shape=jax.ShapeDtypeStruct((mr, lanes), jnp.float32),
        grid=(1,),
        in_specs=[full(a) for a in inputs],
        out_specs=pl.BlockSpec((mr, lanes), lambda i: (0, 0)),
        scratch_shapes=[pltpu.VMEM((N, H + 2, lanes), jnp.bfloat16)],  # h1 padded
        compiler_params=pltpu.CompilerParams(dimension_semantics=("arbitrary",)),
    )(*inputs)

    return jnp.transpose(out2d.reshape(N, H, W, ch_out), (0, 3, 1, 2))  # NCHW


# ------------------------- deterministic params --------------------------------
def init_params(key, ch_in, ch_out):
    # Conv biases intentionally omitted: each conv feeds a train-mode BatchNorm,
    # whose batch-mean subtraction cancels a constant bias exactly.
    ks = jax.random.split(key, 9)
    p = {
        "w1": 0.1 * jax.random.normal(ks[0], (3, 3, ch_in, ch_out), jnp.float32),
        "g1": 1.0 + 0.1 * jax.random.normal(ks[1], (1, ch_out), jnp.float32),
        "be1": 0.1 * jax.random.normal(ks[2], (1, ch_out), jnp.float32),
        "w2": 0.1 * jax.random.normal(ks[3], (3, 3, ch_out, ch_out), jnp.float32),
        "g2": 1.0 + 0.1 * jax.random.normal(ks[4], (1, ch_out), jnp.float32),
        "be2": 0.1 * jax.random.normal(ks[5], (1, ch_out), jnp.float32),
    }
    if ch_in != ch_out:
        p["ws"] = 0.1 * jax.random.normal(ks[6], (ch_in, ch_out), jnp.float32)
        p["gs"] = 1.0 + 0.1 * jax.random.normal(ks[7], (1, ch_out), jnp.float32)
        p["bes"] = 0.1 * jax.random.normal(ks[8], (1, ch_out), jnp.float32)
    return p


# --------------------------- pure-JAX reference --------------------------------
def ref_forward(x_nchw, params, ch_in, ch_out, conv_dtype=jnp.float32):
    """PyTorch train-mode semantics; conv_dtype selects the conv operand dtype."""
    x = jnp.transpose(x_nchw, (0, 2, 3, 1)).astype(jnp.float32)

    def conv(h, wt):
        return jax.lax.conv_general_dilated(
            h.astype(conv_dtype), wt.astype(conv_dtype), (1, 1), "SAME",
            dimension_numbers=("NHWC", "HWIO", "NHWC"),
            preferred_element_type=jnp.float32)

    def bn(y, g, beta):
        mean = jnp.mean(y, axis=(0, 1, 2), keepdims=True)
        var = jnp.mean(jnp.square(y - mean), axis=(0, 1, 2), keepdims=True)
        return (y - mean) * jax.lax.rsqrt(var + EPS) * g.reshape(1, 1, 1, -1) \
            + beta.reshape(1, 1, 1, -1)

    h = jax.nn.relu(bn(conv(x, params["w1"]), params["g1"], params["be1"]))
    h = bn(conv(h, params["w2"]), params["g2"], params["be2"])
    if ch_in != ch_out:
        s = bn(conv(x, params["ws"].reshape(1, 1, ch_in, ch_out)),
               params["gs"], params["bes"])
    else:
        s = x
    return jnp.transpose(s + h, (0, 3, 1, 2))


# ----------------------------------- main ---------------------------------------
if __name__ == "__main__":
    ch_in, ch_out = 4, 8
    N, H, W = 2, 16, 16

    key = jax.random.PRNGKey(0)
    kx, kp = jax.random.split(key)
    x = jax.random.normal(kx, (N, ch_in, H, W), jnp.float32)  # NCHW like PyTorch
    params = init_params(kp, ch_in, ch_out)

    out = jax.block_until_ready(resblk_forward(x, params, ch_in, ch_out))
    assert out.shape == (N, ch_out, H, W), out.shape

    # Tight check vs a reference that uses the same bf16 conv operands:
    # proves the fused conv/BN/ReLU/residual math of the kernel.
    ref_bf = jax.block_until_ready(
        ref_forward(x, params, ch_in, ch_out, conv_dtype=jnp.bfloat16))
    err_t = float(jnp.max(jnp.abs(out - ref_bf)))
    assert jnp.allclose(out, ref_bf, atol=1e-2, rtol=1e-2), err_t

    # Loose check vs the full-f32 (PyTorch-semantics) reference; slack only
    # covers the intentional bf16 MXU-operand rounding.
    ref_f32 = jax.block_until_ready(
        ref_forward(x, params, ch_in, ch_out, conv_dtype=jnp.float32))
    err_l = float(jnp.max(jnp.abs(out - ref_f32)))
    assert jnp.allclose(out, ref_f32, atol=6e-2, rtol=6e-2), err_l

    print("KERNEL_OK")
</pallas_src>

<mosaic_0001>
module attributes {stable_mosaic.version = 11 : i64} {
  func.func @_resblk_kernel(%arg0: i32, %arg1: memref<2x18x64xbf16, #tpu.memory_space<vmem>>, %arg2: memref<192x256xbf16, #tpu.memory_space<vmem>>, %arg3: memref<384x128xbf16, #tpu.memory_space<vmem>>, %arg4: memref<8x8xf32, #tpu.memory_space<vmem>>, %arg5: memref<32x128xf32, #tpu.memory_space<vmem>>, %arg6: memref<2x18x128xbf16, #tpu.memory_space<vmem>>) attributes {dimension_semantics = [#tpu.dimension_semantics<arbitrary>], iteration_bounds = array<i64: 1>, scalar_prefetch = 0 : i64, scratch_operands = 1 : i64, tpu.core_type = #tpu.core_type<tc>, window_params = [{pipeline_mode = #tpu.pipeline_mode<synchronous>, transform_indices = @transform_0, window_bounds = array<i64: 2, 18, 64>}, {pipeline_mode = #tpu.pipeline_mode<synchronous>, transform_indices = @transform_1, window_bounds = array<i64: 192, 256>}, {pipeline_mode = #tpu.pipeline_mode<synchronous>, transform_indices = @transform_2, window_bounds = array<i64: 384, 128>}, {pipeline_mode = #tpu.pipeline_mode<synchronous>, transform_indices = @transform_3, window_bounds = array<i64: 8, 8>}, {pipeline_mode = #tpu.pipeline_mode<synchronous>, transform_indices = @transform_4, window_bounds = array<i64: 32, 128>}]} {
    %0 = tpu.iota {dimensions = array<i32: 0>} : vector<128x8xi32>
    %c8_i32 = arith.constant 8 : i32
    %c0_i32 = arith.constant 0 : i32
    %1 = arith.cmpi eq, %c8_i32, %c0_i32 : i32
    %c1_i32 = arith.constant 1 : i32
    %2 = arith.select %1, %c1_i32, %c8_i32 : i32
    %3 = vector.broadcast %2 : i32 to vector<128x8xi32>
    %4 = arith.remsi %0, %3 : vector<128x8xi32>
    %c0_i32_0 = arith.constant 0 : i32
    %5 = vector.broadcast %c0_i32_0 : i32 to vector<128x8xi32>
    %6 = arith.cmpi ne, %4, %5 : vector<128x8xi32>
    %c0_i32_1 = arith.constant 0 : i32
    %7 = vector.broadcast %c0_i32_1 : i32 to vector<128x8xi32>
    %8 = arith.cmpi slt, %4, %7 : vector<128x8xi32>
    %c0_i32_2 = arith.constant 0 : i32
    %9 = arith.cmpi slt, %2, %c0_i32_2 : i32
    %10 = vector.broadcast %9 : i1 to vector<128x8xi1>
    %11 = vector.broadcast %10 : vector<128x8xi1> to vector<128x8xi1>
    %12 = arith.xori %8, %11 : vector<128x8xi1>
    %13 = arith.andi %12, %6 : vector<128x8xi1>
    %14 = vector.broadcast %2 : i32 to vector<128x8xi32>
    %15 = arith.addi %4, %14 : vector<128x8xi32>
    %16 = arith.select %13, %15, %4 : vector<128x8xi1>, vector<128x8xi32>
    %17 = tpu.iota {dimensions = array<i32: 1>} : vector<128x8xi32>
    %18 = arith.cmpi eq, %16, %17 : vector<128x8xi32>
    %19 = arith.extui %18 : vector<128x8xi1> to vector<128x8xi32>
    %20 = arith.sitofp %19 : vector<128x8xi32> to vector<128x8xf32>
    %21 = tpu.iota {dimensions = array<i32: 0>} : vector<8x128xi32>
    %22 = tpu.iota {dimensions = array<i32: 1>} : vector<8x128xi32>
    %c8_i32_3 = arith.constant 8 : i32
    %c0_i32_4 = arith.constant 0 : i32
    %23 = arith.cmpi eq, %c8_i32_3, %c0_i32_4 : i32
    %c1_i32_5 = arith.constant 1 : i32
    %24 = arith.select %23, %c1_i32_5, %c8_i32_3 : i32
    %25 = vector.broadcast %24 : i32 to vector<8x128xi32>
    %26 = arith.remsi %22, %25 : vector<8x128xi32>
    %c0_i32_6 = arith.constant 0 : i32
    %27 = vector.broadcast %c0_i32_6 : i32 to vector<8x128xi32>
    %28 = arith.cmpi ne, %26, %27 : vector<8x128xi32>
    %c0_i32_7 = arith.constant 0 : i32
    %29 = vector.broadcast %c0_i32_7 : i32 to vector<8x128xi32>
    %30 = arith.cmpi slt, %26, %29 : vector<8x128xi32>
    %c0_i32_8 = arith.constant 0 : i32
    %31 = arith.cmpi slt, %24, %c0_i32_8 : i32
    %32 = vector.broadcast %31 : i1 to vector<8x128xi1>
    %33 = vector.broadcast %32 : vector<8x128xi1> to vector<8x128xi1>
    %34 = arith.xori %30, %33 : vector<8x128xi1>
    %35 = arith.andi %34, %28 : vector<8x128xi1>
    %36 = vector.broadcast %24 : i32 to vector<8x128xi32>
    %37 = arith.addi %26, %36 : vector<8x128xi32>
    %38 = arith.select %35, %37, %26 : vector<8x128xi1>, vector<8x128xi32>
    %39 = arith.cmpi eq, %21, %38 : vector<8x128xi32>
    %40 = arith.extui %39 : vector<8x128xi1> to vector<8x128xi32>
    %41 = arith.sitofp %40 : vector<8x128xi32> to vector<8x128xf32>
    %c0 = arith.constant 0 : index
    %c0_9 = arith.constant 0 : index
    %42 = vector.load %arg4[%c0, %c0_9] : memref<8x8xf32, #tpu.memory_space<vmem>>, vector<8x8xf32>
    %c0_10 = arith.constant 0 : index
    %c0_11 = arith.constant 0 : index
    %c0_12 = arith.constant 0 : index
    %43 = vector.load %arg1[%c0_10, %c0_11, %c0_12] : memref<2x18x64xbf16, #tpu.memory_space<vmem>>, vector<2x18x64xbf16>
    %44 = vector.extract_strided_slice %43 {offsets = [0, 0, 0], sizes = [2, 16, 64], strides = [1, 1, 1]} : vector<2x18x64xbf16> to vector<2x16x64xbf16>
    %45 = vector.extract_strided_slice %43 {offsets = [0, 1, 0], sizes = [2, 16, 64], strides = [1, 1, 1]} : vector<2x18x64xbf16> to vector<2x16x64xbf16>
    %46 = vector.extract_strided_slice %43 {offsets = [0, 2, 0], sizes = [2, 16, 64], strides = [1, 1, 1]} : vector<2x18x64xbf16> to vector<2x16x64xbf16>
    %47 = tpu.concatenate %44, %45, %46 in 2 : vector<2x16x64xbf16>, vector<2x16x64xbf16>, vector<2x16x64xbf16> -> vector<2x16x192xbf16>
    %48 = vector.shape_cast %47 : vector<2x16x192xbf16> to vector<32x192xbf16>
    %c0_13 = arith.constant 0 : index
    %c0_14 = arith.constant 0 : index
    %49 = vector.load %arg2[%c0_13, %c0_14] : memref<192x256xbf16, #tpu.memory_space<vmem>>, vector<192x256xbf16>
    %cst = arith.constant dense<0.000000e+00> : vector<32x256xf32>
    %50 = tpu.matmul %48, %49, %cst {dimension_numbers = #tpu.dot_dimension_numbers<[1], [0], [0], [1], [0, 0, 1, 1], [], []>} : vector<32x192xbf16>, vector<192x256xbf16>, vector<32x256xf32> -> vector<32x256xf32>
    %51 = vector.extract_strided_slice %50 {offsets = [0, 0], sizes = [32, 128], strides = [1, 1]} : vector<32x256xf32> to vector<32x128xf32>
    %52 = vector.extract_strided_slice %42 {offsets = [0, 0], sizes = [1, 8], strides = [1, 1]} : vector<8x8xf32> to vector<1x8xf32>
    %53 = vector.extract_strided_slice %42 {offsets = [1, 0], sizes = [1, 8], strides = [1, 1]} : vector<8x8xf32> to vector<1x8xf32>
    %cst_15 = arith.constant dense<0.000000e+00> : vector<128xf32>
    %54 = vector.multi_reduction <add>, %51, %cst_15 [0] : vector<32x128xf32> to vector<128xf32>
    %55 = vector.shape_cast %54 : vector<128xf32> to vector<1x128xf32>
    %56 = arith.mulf %51, %51 : vector<32x128xf32>
    %cst_16 = arith.constant dense<0.000000e+00> : vector<128xf32>
    %57 = vector.multi_reduction <add>, %56, %cst_16 [0] : vector<32x128xf32> to vector<128xf32>
    %58 = vector.shape_cast %57 : vector<128xf32> to vector<1x128xf32>
    %59 = tpu.concatenate %55, %58 in 0 : vector<1x128xf32>, vector<1x128xf32> -> vector<2x128xf32>
    %cst_17 = arith.constant dense<0.000000e+00> : vector<2x8xf32>
    %60 = tpu.matmul %59, %20, %cst_17 {dimension_numbers = #tpu.dot_dimension_numbers<[1], [0], [0], [1], [0, 0, 1, 1], [], []>} : vector<2x128xf32>, vector<128x8xf32>, vector<2x8xf32> -> vector<2x8xf32>
    %61 = vector.extract_strided_slice %60 {offsets = [0, 0], sizes = [1, 8], strides = [1, 1]} : vector<2x8xf32> to vector<1x8xf32>
    %cst_18 = arith.constant 0.001953125 : f32
    %62 = vector.broadcast %cst_18 : f32 to vector<1x8xf32>
    %63 = arith.mulf %61, %62 : vector<1x8xf32>
    %64 = vector.extract_strided_slice %60 {offsets = [1, 0], sizes = [1, 8], strides = [1, 1]} : vector<2x8xf32> to vector<1x8xf32>
    %cst_19 = arith.constant 0.001953125 : f32
    %65 = vector.broadcast %cst_19 : f32 to vector<1x8xf32>
    %66 = arith.mulf %64, %65 : vector<1x8xf32>
    %67 = arith.mulf %63, %63 : vector<1x8xf32>
    %68 = arith.subf %66, %67 : vector<1x8xf32>
    %cst_20 = arith.constant 0.000000e+00 : f32
    %69 = vector.broadcast %cst_20 : f32 to vector<1x8xf32>
    %70 = arith.maximumf %68, %69 : vector<1x8xf32>
    %cst_21 = arith.constant 9.99999974E-6 : f32
    %71 = vector.broadcast %cst_21 : f32 to vector<1x8xf32>
    %72 = arith.addf %70, %71 : vector<1x8xf32>
    %73 = math.rsqrt %72 : vector<1x8xf32>
    %74 = arith.mulf %52, %73 : vector<1x8xf32>
    %75 = arith.mulf %63, %74 : vector<1x8xf32>
    %76 = arith.subf %53, %75 : vector<1x8xf32>
    %77 = tpu.concatenate %74, %76 in 0 : vector<1x8xf32>, vector<1x8xf32> -> vector<2x8xf32>
    %cst_22 = arith.constant dense<0.000000e+00> : vector<2x128xf32>
    %78 = tpu.matmul %77, %41, %cst_22 {dimension_numbers = #tpu.dot_dimension_numbers<[1], [0], [0], [1], [0, 0, 1, 1], [], []>} : vector<2x8xf32>, vector<8x128xf32>, vector<2x128xf32> -> vector<2x128xf32>
    %79 = vector.extract_strided_slice %78 {offsets = [0, 0], sizes = [1, 128], strides = [1, 1]} : vector<2x128xf32> to vector<1x128xf32>
    %80 = vector.broadcast %79 : vector<1x128xf32> to vector<32x128xf32>
    %81 = arith.mulf %51, %80 : vector<32x128xf32>
    %82 = vector.extract_strided_slice %78 {offsets = [1, 0], sizes = [1, 128], strides = [1, 1]} : vector<2x128xf32> to vector<1x128xf32>
    %83 = vector.broadcast %82 : vector<1x128xf32> to vector<32x128xf32>
    %84 = arith.addf %81, %83 : vector<32x128xf32>
    %cst_23 = arith.constant 0.000000e+00 : f32
    %85 = vector.broadcast %cst_23 : f32 to vector<32x128xf32>
    %86 = arith.maximumf %84, %85 : vector<32x128xf32>
    %87 = arith.truncf %86 : vector<32x128xf32> to vector<32x128xbf16>
    %cst_24 = arith.constant 0.000000e+00 : bf16
    %88 = vector.broadcast %cst_24 : bf16 to vector<2x18x128xbf16>
    %c0_25 = arith.constant 0 : index
    %c0_26 = arith.constant 0 : index
    %c0_27 = arith.constant 0 : index
    %89 = vector.load %arg6[%c0_25, %c0_26, %c0_27] : memref<2x18x128xbf16, #tpu.memory_space<vmem>>, vector<2x18x128xbf16>
    tpu.vector_store %arg6[%c0_25, %c0_26, %c0_27], %88 {strides = array<i32>} : memref<2x18x128xbf16, #tpu.memory_space<vmem>>, vector<2x18x128xbf16>,
    %90 = vector.shape_cast %87 : vector<32x128xbf16> to vector<2x16x128xbf16>
    %c0_28 = arith.constant 0 : index
    %c1 = arith.constant 1 : index
    %c0_29 = arith.constant 0 : index
    %91 = vector.load %arg6[%c0_28, %c1, %c0_29] : memref<2x18x128xbf16, #tpu.memory_space<vmem>>, vector<2x16x128xbf16>
    tpu.vector_store %arg6[%c0_28, %c1, %c0_29], %90 {strides = array<i32>} : memref<2x18x128xbf16, #tpu.memory_space<vmem>>, vector<2x16x128xbf16>,
    %c0_30 = arith.constant 0 : index
    %c0_31 = arith.constant 0 : index
    %c0_32 = arith.constant 0 : index
    %92 = vector.load %arg6[%c0_30, %c0_31, %c0_32] : memref<2x18x128xbf16, #tpu.memory_space<vmem>>, vector<2x16x128xbf16>
    %c0_33 = arith.constant 0 : index
    %c1_34 = arith.constant 1 : index
    %c0_35 = arith.constant 0 : index
    %93 = vector.load %arg6[%c0_33, %c1_34, %c0_35] : memref<2x18x128xbf16, #tpu.memory_space<vmem>>, vector<2x16x128xbf16>
    %c0_36 = arith.constant 0 : index
    %c2 = arith.constant 2 : index
    %c0_37 = arith.constant 0 : index
    %94 = vector.load %arg6[%c0_36, %c2, %c0_37] : memref<2x18x128xbf16, #tpu.memory_space<vmem>>, vector<2x16x128xbf16>
    %95 = tpu.concatenate %92, %93, %94 in 2 : vector<2x16x128xbf16>, vector<2x16x128xbf16>, vector<2x16x128xbf16> -> vector<2x16x384xbf16>
    %96 = vector.shape_cast %95 : vector<2x16x384xbf16> to vector<32x384xbf16>
    %c0_38 = arith.constant 0 : index
    %c0_39 = arith.constant 0 : index
    %97 = vector.load %arg3[%c0_38, %c0_39] : memref<384x128xbf16, #tpu.memory_space<vmem>>, vector<384x128xbf16>
    %cst_40 = arith.constant dense<0.000000e+00> : vector<32x128xf32>
    %98 = tpu.matmul %96, %97, %cst_40 {dimension_numbers = #tpu.dot_dimension_numbers<[1], [0], [0], [1], [0, 0, 1, 1], [], []>} : vector<32x384xbf16>, vector<384x128xbf16>, vector<32x128xf32> -> vector<32x128xf32>
    %99 = vector.extract_strided_slice %42 {offsets = [2, 0], sizes = [1, 8], strides = [1, 1]} : vector<8x8xf32> to vector<1x8xf32>
    %100 = vector.extract_strided_slice %42 {offsets = [3, 0], sizes = [1, 8], strides = [1, 1]} : vector<8x8xf32> to vector<1x8xf32>
    %cst_41 = arith.constant dense<0.000000e+00> : vector<128xf32>
    %101 = vector.multi_reduction <add>, %98, %cst_41 [0] : vector<32x128xf32> to vector<128xf32>
    %102 = vector.shape_cast %101 : vector<128xf32> to vector<1x128xf32>
    %103 = arith.mulf %98, %98 : vector<32x128xf32>
    %cst_42 = arith.constant dense<0.000000e+00> : vector<128xf32>
    %104 = vector.multi_reduction <add>, %103, %cst_42 [0] : vector<32x128xf32> to vector<128xf32>
    %105 = vector.shape_cast %104 : vector<128xf32> to vector<1x128xf32>
    %106 = tpu.concatenate %102, %105 in 0 : vector<1x128xf32>, vector<1x128xf32> -> vector<2x128xf32>
    %cst_43 = arith.constant dense<0.000000e+00> : vector<2x8xf32>
    %107 = tpu.matmul %106, %20, %cst_43 {dimension_numbers = #tpu.dot_dimension_numbers<[1], [0], [0], [1], [0, 0, 1, 1], [], []>} : vector<2x128xf32>, vector<128x8xf32>, vector<2x8xf32> -> vector<2x8xf32>
    %108 = vector.extract_strided_slice %107 {offsets = [0, 0], sizes = [1, 8], strides = [1, 1]} : vector<2x8xf32> to vector<1x8xf32>
    %cst_44 = arith.constant 0.001953125 : f32
    %109 = vector.broadcast %cst_44 : f32 to vector<1x8xf32>
    %110 = arith.mulf %108, %109 : vector<1x8xf32>
    %111 = vector.extract_strided_slice %107 {offsets = [1, 0], sizes = [1, 8], strides = [1, 1]} : vector<2x8xf32> to vector<1x8xf32>
    %cst_45 = arith.constant 0.001953125 : f32
    %112 = vector.broadcast %cst_45 : f32 to vector<1x8xf32>
    %113 = arith.mulf %111, %112 : vector<1x8xf32>
    %114 = arith.mulf %110, %110 : vector<1x8xf32>
    %115 = arith.subf %113, %114 : vector<1x8xf32>
    %cst_46 = arith.constant 0.000000e+00 : f32
    %116 = vector.broadcast %cst_46 : f32 to vector<1x8xf32>
    %117 = arith.maximumf %115, %116 : vector<1x8xf32>
    %cst_47 = arith.constant 9.99999974E-6 : f32
    %118 = vector.broadcast %cst_47 : f32 to vector<1x8xf32>
    %119 = arith.addf %117, %118 : vector<1x8xf32>
    %120 = math.rsqrt %119 : vector<1x8xf32>
    %121 = arith.mulf %99, %120 : vector<1x8xf32>
    %122 = arith.mulf %110, %121 : vector<1x8xf32>
    %123 = arith.subf %100, %122 : vector<1x8xf32>
    %124 = tpu.concatenate %121, %123 in 0 : vector<1x8xf32>, vector<1x8xf32> -> vector<2x8xf32>
    %cst_48 = arith.constant dense<0.000000e+00> : vector<2x128xf32>
    %125 = tpu.matmul %124, %41, %cst_48 {dimension_numbers = #tpu.dot_dimension_numbers<[1], [0], [0], [1], [0, 0, 1, 1], [], []>} : vector<2x8xf32>, vector<8x128xf32>, vector<2x128xf32> -> vector<2x128xf32>
    %126 = vector.extract_strided_slice %125 {offsets = [0, 0], sizes = [1, 128], strides = [1, 1]} : vector<2x128xf32> to vector<1x128xf32>
    %127 = vector.broadcast %126 : vector<1x128xf32> to vector<32x128xf32>
    %128 = arith.mulf %98, %127 : vector<32x128xf32>
    %129 = vector.extract_strided_slice %125 {offsets = [1, 0], sizes = [1, 128], strides = [1, 1]} : vector<2x128xf32> to vector<1x128xf32>
    %130 = vector.broadcast %129 : vector<1x128xf32> to vector<32x128xf32>
    %131 = arith.addf %128, %130 : vector<32x128xf32>
    %132 = vector.extract_strided_slice %50 {offsets = [0, 128], sizes = [32, 128], strides = [1, 1]} : vector<32x256xf32> to vector<32x128xf32>
    %133 = vector.extract_strided_slice %42 {offsets = [4, 0], sizes = [1, 8], strides = [1, 1]} : vector<8x8xf32> to vector<1x8xf32>
    %134 = vector.extract_strided_slice %42 {offsets = [5, 0], sizes = [1, 8], strides = [1, 1]} : vector<8x8xf32> to vector<1x8xf32>
    %cst_49 = arith.constant dense<0.000000e+00> : vector<128xf32>
    %135 = vector.multi_reduction <add>, %132, %cst_49 [0] : vector<32x128xf32> to vector<128xf32>
    %136 = vector.shape_cast %135 : vector<128xf32> to vector<1x128xf32>
    %137 = arith.mulf %132, %132 : vector<32x128xf32>
    %cst_50 = arith.constant dense<0.000000e+00> : vector<128xf32>
    %138 = vector.multi_reduction <add>, %137, %cst_50 [0] : vector<32x128xf32> to vector<128xf32>
    %139 = vector.shape_cast %138 : vector<128xf32> to vector<1x128xf32>
    %140 = tpu.concatenate %136, %139 in 0 : vector<1x128xf32>, vector<1x128xf32> -> vector<2x128xf32>
    %cst_51 = arith.constant dense<0.000000e+00> : vector<2x8xf32>
    %141 = tpu.matmul %140, %20, %cst_51 {dimension_numbers = #tpu.dot_dimension_numbers<[1], [0], [0], [1], [0, 0, 1, 1], [], []>} : vector<2x128xf32>, vector<128x8xf32>, vector<2x8xf32> -> vector<2x8xf32>
    %142 = vector.extract_strided_slice %141 {offsets = [0, 0], sizes = [1, 8], strides = [1, 1]} : vector<2x8xf32> to vector<1x8xf32>
    %cst_52 = arith.constant 0.001953125 : f32
    %143 = vector.broadcast %cst_52 : f32 to vector<1x8xf32>
    %144 = arith.mulf %142, %143 : vector<1x8xf32>
    %145 = vector.extract_strided_slice %141 {offsets = [1, 0], sizes = [1, 8], strides = [1, 1]} : vector<2x8xf32> to vector<1x8xf32>
    %cst_53 = arith.constant 0.001953125 : f32
    %146 = vector.broadcast %cst_53 : f32 to vector<1x8xf32>
    %147 = arith.mulf %145, %146 : vector<1x8xf32>
    %148 = arith.mulf %144, %144 : vector<1x8xf32>
    %149 = arith.subf %147, %148 : vector<1x8xf32>
    %cst_54 = arith.constant 0.000000e+00 : f32
    %150 = vector.broadcast %cst_54 : f32 to vector<1x8xf32>
    %151 = arith.maximumf %149, %150 : vector<1x8xf32>
    %cst_55 = arith.constant 9.99999974E-6 : f32
    %152 = vector.broadcast %cst_55 : f32 to vector<1x8xf32>
    %153 = arith.addf %151, %152 : vector<1x8xf32>
    %154 = math.rsqrt %153 : vector<1x8xf32>
    %155 = arith.mulf %133, %154 : vector<1x8xf32>
    %156 = arith.mulf %144, %155 : vector<1x8xf32>
    %157 = arith.subf %134, %156 : vector<1x8xf32>
    %158 = tpu.concatenate %155, %157 in 0 : vector<1x8xf32>, vector<1x8xf32> -> vector<2x8xf32>
    %cst_56 = arith.constant dense<0.000000e+00> : vector<2x128xf32>
    %159 = tpu.matmul %158, %41, %cst_56 {dimension_numbers = #tpu.dot_dimension_numbers<[1], [0], [0], [1], [0, 0, 1, 1], [], []>} : vector<2x8xf32>, vector<8x128xf32>, vector<2x128xf32> -> vector<2x128xf32>
    %160 = vector.extract_strided_slice %159 {offsets = [0, 0], sizes = [1, 128], strides = [1, 1]} : vector<2x128xf32> to vector<1x128xf32>
    %161 = vector.broadcast %160 : vector<1x128xf32> to vector<32x128xf32>
    %162 = arith.mulf %132, %161 : vector<32x128xf32>
    %163 = vector.extract_strided_slice %159 {offsets = [1, 0], sizes = [1, 128], strides = [1, 1]} : vector<2x128xf32> to vector<1x128xf32>
    %164 = vector.broadcast %163 : vector<1x128xf32> to vector<32x128xf32>
    %165 = arith.addf %162, %164 : vector<32x128xf32>
    %166 = arith.addf %131, %165 : vector<32x128xf32>
    %c0_57 = arith.constant 0 : index
    %c0_58 = arith.constant 0 : index
    %167 = vector.load %arg5[%c0_57, %c0_58] : memref<32x128xf32, #tpu.memory_space<vmem>>, vector<32x128xf32>
    tpu.vector_store %arg5[%c0_57, %c0_58], %166 {strides = array<i32>} : memref<32x128xf32, #tpu.memory_space<vmem>>, vector<32x128xf32>,
    return
  }
  func.func @transform_0(%arg0: i32) -> (i32, i32, i32) {
    %c0_i32 = arith.constant 0 : i32
    %c0_i32_0 = arith.constant 0 : i32
    %c0_i32_1 = arith.constant 0 : i32
    %c0_i32_2 = arith.constant 0 : i32
    return %c0_i32, %c0_i32_0, %c0_i32_1 : i32, i32, i32
  }
  func.func @transform_1(%arg0: i32) -> (i32, i32) {
    %c0_i32 = arith.constant 0 : i32
    %c0_i32_0 = arith.constant 0 : i32
    %c0_i32_1 = arith.constant 0 : i32
    return %c0_i32, %c0_i32_0 : i32, i32
  }
  func.func @transform_2(%arg0: i32) -> (i32, i32) {
    %c0_i32 = arith.constant 0 : i32
    %c0_i32_0 = arith.constant 0 : i32
    %c0_i32_1 = arith.constant 0 : i32
    return %c0_i32, %c0_i32_0 : i32, i32
  }
  func.func @transform_3(%arg0: i32) -> (i32, i32) {
    %c0_i32 = arith.constant 0 : i32
    %c0_i32_0 = arith.constant 0 : i32
    %c0_i32_1 = arith.constant 0 : i32
    return %c0_i32, %c0_i32_0 : i32, i32
  }
  func.func @transform_4(%arg0: i32) -> (i32, i32) {
    %c0_i32 = arith.constant 0 : i32
    %c0_i32_0 = arith.constant 0 : i32
    %c0_i32_1 = arith.constant 0 : i32
    return %c0_i32, %c0_i32_0 : i32, i32
  }
}

</mosaic_0001>

<bundles_post_ra>
// kernel: tpu_custom_call.1
= control target key start
LH: loop header
LB: loop body
LE: loop exit
PB: predicated region body
PF: predicated region fallthrough
CT: control target
= control target key end

     0   :  { %9 = vsyncpa [#allocation4], 0  ;;  %s2748_s0 = inlined_call_operand.vmem [shape: bf16[2,18,64], index: 0, kind: input, shape index: {}]   ;;  %s2749_s1 = inlined_call_operand.hbm [shape: bf16[192,256], index: 1, kind: input, shape index: {}]   ;;  %s2750_s2 = inlined_call_operand.hbm [shape: bf16[384,128], index: 2, kind: input, shape index: {}]   ;;  %s2751_s3 = inlined_call_operand.vmem [shape: f32[8,8], index: 3, kind: input, shape index: {}]   ;;  %s2752_s4 = inlined_call_operand.hbm [shape: f32[32,128], index: 4, kind: output, shape index: {}]  }
   0x1   :  { %10 = vsyncpa [#allocation7], 0 }
   0x2   :  { %11 = vsyncpa [#allocation5], 0  ;;  %s2200_s15 = smov [#allocation3]  }
   0x3   :  { %s19_s16 = sshll.u32 %s2200_s15, 4  ;;  %s20_s16 = int_to_ptr.vmem [resolvable:$true] %s19_s16 }
   0x4   :  { %s2142_s17 = scalar_lea.vmem %s20_s16, 3072  ;;  %p2147_p1 = scmp.lt.s32.totalorder %s20_s16, %s20_s16 }
   0x5   :  { %p2143_p0 = scmp.ne.s32.totalorder %s20_s16, %s2142_s17  ;;  %p2148_p2 = scmp.lt.s32.totalorder %s2142_s17, %s2142_s17 }
   0x7   :  { %p2149_p3 = por %p2148_p2, %p2147_p1 }
   0x9   :  { %p2150_p4 = pnand %p2149_p3, %p2143_p0 }
   0xb   :  { %2153 = shalt.err (!%p2150_p4)
}
   0xc   :  { %s2201_s18 = smov 128   ;;  %s2202_s19 = smov 8  }
   0xd   :  { %25 = dma.hbm_to_vmem [thread:$0]  %s2749_s1, 3072, %s20_s16, [#allocation4], %s2201_s18, %s2201_s18, %s2202_s19  }
   0xe   :  { %s2203_s22 = smov [#allocation6]  }
   0xf   :  { %s31_s23 = sshll.u32 %s2203_s22, 4  ;;  %s32_s23 = int_to_ptr.vmem [resolvable:$true] %s31_s23 }
  0x10   :  { %s2162_s24 = scalar_lea.vmem %s32_s23, 3072  ;;  %p2167_p6 = scmp.lt.s32.totalorder %s32_s23, %s32_s23 }
  0x11   :  { %p2163_p5 = scmp.ne.s32.totalorder %s32_s23, %s2162_s24  ;;  %p2168_p7 = scmp.lt.s32.totalorder %s2162_s24, %s2162_s24 }
  0x13   :  { %p2169_p8 = por %p2168_p7, %p2167_p6 }
  0x15   :  { %p2170_p9 = pnand %p2169_p8, %p2163_p5 }
  0x17   :  { %2173 = shalt.err (!%p2170_p9)
}
  0x18   :  { %s2204_s25 = smov 64   ;;  %s2205_s26 = smov 4  }
  0x19   :  { %37 = dma.hbm_to_vmem [thread:$0]  %s2750_s2, 3072, %s32_s23, [#allocation7], %s2204_s25, %s2204_s25, %s2205_s26  }
  0x1a   :  { %2194 = dma.done.wait [#allocation4], 3072  }
  0x1b   :  { %2195 = vsyncadd [#allocation4], 4294964224 }
  0x1c   :  { %2196 = dma.done.wait [#allocation7], 3072  }
  0x1d   :  { %2197 = vsyncadd [#allocation7], 4294964224  ;;  %vm2753_vm0 = vsmask.f32 7424  ;;  %v2250_v0 = vld [vmem:[%s2748_s0] sm:$0xff]   ;;  %v2258_v2 = vld [vmem:[%s2748_s0 + $0xc] sm:$0xff]   ;;  %v47_v20 = vlaneseq }
  0x1e   :  { %v2059_v1 = vld [vmem:[%s2748_s0 + $0x8] ss:$0 sps:$4 sm:$0x11]   ;;  %v346_v3 = vshrl.u32 %v2250_v0, 16  ;;  %v348_v4 = vshll.u32 %v2250_v0, 16  ;;  %v358_v7 = vshrl.u32 %v2258_v2, 16 }
  0x1f   :  { %v353_v5 = vshll.u32 %v2059_v1, 16  ;;  %v2265_v6 = vld [vmem:[%s2748_s0 + $0x14] ss:$0 sps:$4 sm:$0x11]   ;;  %v360_v8 = vshll.u32 %v2258_v2, 16  ;;  %vm2754_vm1 = vcmask 1046528  }
  0x20   :  { %v2062_v9 = vld [vmem:[#allocation3 + $0x74] ss:$8 sps:$4 sm:$0xff]   ;;  %v350_v10 = vrot.slane %v348_v4, 1  ;;  %v365_v12 = vshll.u32 %v2265_v6, 16  ;;  %v2064_v13 = vld [vmem:[#allocation3 + $0x70] ss:$8 sps:$4 sm:$0xff]  }
  0x21   :  { %v355_v11 = vrot.slane %v353_v5, 1  ;;  %v362_v14 = vrot.slane %v360_v8, 1  ;;  %537 = vmatprep.subr.bf16.mxu0 %v2062_v9  ;;  %v2065_v15 = vld [vmem:[#allocation3 + $0x64] ss:$8 sps:$4 sm:$0xff]   ;;  %v2067_v18 = vld [vmem:[#allocation3 + $0x60] ss:$8 sps:$4 sm:$0xff]  }
  0x22   :  { %v351_v16 = vor.u32 %v350_v10, %v346_v3  ;;  %v367_v17 = vrot.slane %v365_v12, 1  ;;  %538 = vmatpush1.bf16.msra.mxu0 %v2064_v13  ;;  %v374_v19 = vrot.slane %v2250_v0, 1  ;;  %v2068_v22 = vld [vmem:[#allocation3 + $0x54] ss:$8 sps:$4 sm:$0xff]   ;;  %v375_v23 = vrot.slane %v2059_v1, 1 }
  0x23   :  { %v363_v21 = vor.u32 %v362_v14, %v358_v7  ;;  %539 = vmatprep.subr.bf16.mxu0 %v2065_v15  ;;  %vm380_vm2 = vcmask 523264   ;;  %v2070_v27 = vld [vmem:[#allocation3 + $0x50] ss:$8 sps:$4 sm:$0xff]   ;;  %v2276_v28 = vshrl.u32 %v47_v20, 7  ;;  %v2071_v29 = vld [vmem:[#allocation3 + $0x44] ss:$8 sps:$4 sm:$0xff]  }
  0x24   :  { %v356_v24 = vsel %vm2753_vm0, %v351_v16, %v355_v11  ;;  %v376_v25 = vsel %vm2754_vm1, %v374_v19, %v375_v23  ;;  %v2206_v30 = vmov 0.0   ;;  %v2280_v32 = vand.u32 127, %v47_v20  ;;  %v2073_v33 = vld [vmem:[#allocation3 + $0x40] ss:$8 sps:$4 sm:$0xff]   ;;  %v2074_v35 = vld [vmem:[#allocation3 + $0x34] ss:$8 sps:$4 sm:$0xff]  }
  0x25   :  { %369 = vrot.lane.b32.xlu0 %v356_v24, %s2204_s25  ;;  %v368_v26 = vsel %vm2753_vm0, %v363_v21, %v367_v17  ;;  %1718 = vmatprep.mubr.msk.bf16.mxu0 %vm380_vm2, %v376_v25  ;;  %v63_v31 = vadd.s32 120, %v2276_v28  ;;  %v2207_v37 = vmov 1.0   ;;  %v2076_v38 = vld [vmem:[#allocation3 + $0x30] ss:$8 sps:$4 sm:$0xff]   ;;  %v2077_v39 = vld [vmem:[#allocation3 + $0x24] ss:$8 sps:$4 sm:$0xff]  }
  0x26   :  { %540 = vmatpush1.bf16.msra.mxu0 %v2067_v18  ;;  %1907 = vmatprep.subr.mxu1 %v2206_v30  ;;  %v2079_v40 = vld [vmem:[#allocation3 + $0x20] ss:$8 sps:$4 sm:$0xff]   ;;  %v2080_v41 = vld [vmem:[#allocation3 + $0x14] ss:$8 sps:$4 sm:$0xff]   ;;  %v2082_v42 = vld [vmem:[#allocation3 + $0x10] ss:$8 sps:$4 sm:$0xff]  }
  0x27   :  { %541 = vmatprep.subr.bf16.mxu0 %v2068_v22  ;;  %v173_v34 = vand.u32 7, %v63_v31  ;;  %v2083_v43 = vld [vmem:[#allocation3 + $0x4] ss:$8 sps:$4 sm:$0xff]   ;;  %v2085_v44 = vld [vmem:[#allocation3] ss:$8 sps:$4 sm:$0xff]   ;;  %v377_v53 = vrot.slane %v2258_v2, 1 }
  0x28   :  { %v2086_v45 = vld [vmem:[#allocation3 + $0xb4] ss:$8 sps:$4 sm:$0xff]   ;;  %v2088_v46 = vld [vmem:[#allocation3 + $0xb0] ss:$8 sps:$4 sm:$0xff]   ;;  %v2089_v47 = vld [vmem:[#allocation3 + $0xa4] ss:$8 sps:$4 sm:$0xff]  }
  0x29   :  { %371 = vrot.lane.b32.xlu0 %v368_v26, %s2204_s25  ;;  %vm2284_vm3 = vcmp.eq.s32.totalorder %v173_v34, %v2280_v32  ;;  %v2091_v48 = vld [vmem:[#allocation3 + $0xa0] ss:$8 sps:$4 sm:$0xff]   ;;  %v2092_v49 = vld [vmem:[#allocation3 + $0x94] ss:$8 sps:$4 sm:$0xff]   ;;  %v2094_v50 = vld [vmem:[#allocation3 + $0x90] ss:$8 sps:$4 sm:$0xff]  }
  0x2a   :  { %542 = vmatpush1.bf16.msra.mxu0 %v2070_v27  ;;  %1908 = vmatpush3.msk.msra.mxu1 %vm2284_vm3, %v2207_v37  ;;  %v2095_v51 = vld [vmem:[#allocation3 + $0x84] ss:$8 sps:$4 sm:$0xff]   ;;  %v2097_v52 = vld [vmem:[#allocation3 + $0x80] ss:$8 sps:$4 sm:$0xff]   ;;  %v378_v54 = vrot.slane %v2265_v6, 1  ;;  %v62_v60 = vadd.s32 112, %v2276_v28 }
  0x2b   :  { %543 = vmatprep.subr.bf16.mxu0 %v2071_v29  ;;  %1909 = vmatprep.subr.mxu1 %v2206_v30  ;;  %v61_v62 = vadd.s32 104, %v2276_v28  ;;  %v59_v4 = vadd.s32 88, %v2276_v28  ;;  %v58_v7 = vadd.s32 80, %v2276_v28  ;;  %v57_v10 = vadd.s32 72, %v2276_v28 }
  0x2c   :  { %v379_v56 = vsel %vm2754_vm1, %v377_v53, %v378_v54  ;;  %v166_v61 = vand.u32 7, %v62_v60  ;;  %v56_v13 = vadd.s32 64, %v2276_v28  ;;  %v55_v16 = vadd.s32 56, %v2276_v28 }
  0x2d   :  { %v159_v1 = vand.u32 7, %v61_v62  ;;  %v145_v6 = vand.u32 7, %v59_v4  ;;  %v138_v9 = vand.u32 7, %v58_v7  ;;  %v131_v12 = vand.u32 7, %v57_v10 }
  0x2e   :  { %544 = vmatpush1.bf16.msra.mxu0 %v2073_v33  ;;  %vm2303_vm4 = vcmp.eq.s32.totalorder %v166_v61, %v2280_v32  ;;  %v124_v15 = vand.u32 7, %v56_v13  ;;  %v117_v18 = vand.u32 7, %v55_v16  ;;  %v54_v19 = vadd.s32 48, %v2276_v28 }
  0x2f   :  { %545 = vmatprep.subr.bf16.mxu0 %v2074_v35  ;;  %1910 = vmatpush3.msk.msra.mxu1 %vm2303_vm4, %v2207_v37  ;;  %vm2313_vm5 = vcmp.eq.s32.totalorder %v159_v1, %v2280_v32  ;;  %vm2333_vm7 = vcmp.eq.s32.totalorder %v145_v6, %v2280_v32  ;;  %vm2343_vm8 = vcmp.eq.s32.totalorder %v138_v9, %v2280_v32  ;;  %v2793_v20 = vmov 0 }
  0x30   :  { %1911 = vmatprep.subr.mxu1 %v2206_v30  ;;  %vm2353_vm9 = vcmp.eq.s32.totalorder %v131_v12, %v2280_v32  ;;  %vm2363_vm10 = vcmp.eq.s32.totalorder %v124_v15, %v2280_v32  ;;  %vm2373_vm11 = vcmp.eq.s32.totalorder %v117_v18, %v2280_v32  ;;  %v110_v21 = vand.u32 7, %v54_v19 }
  0x31   :  { %1912 = vmatpush3.msk.msra.mxu1 %vm2313_vm5, %v2207_v37  ;;  %v2794_v20 = vsel %vm2373_vm11, 4294967295, %v2793_v20  ;;  %v53_v22 = vadd.s32 40, %v2276_v28  ;;  %v2795_v23 = vmov 0  ;;  %v52_v25 = vadd.s32 32, %v2276_v28 }
  0x32   :  { %546 = vmatpush1.bf16.msra.mxu0 %v2076_v38  ;;  %1913 = vmatprep.subr.mxu1 %v2206_v30  ;;  %vm2383_vm12 = vcmp.eq.s32.totalorder %v110_v21, %v2280_v32  ;;  %v2797_v26 = vmov 0  ;;  %v51_v29 = vadd.s32 24, %v2276_v28  ;;  %v2799_v31 = vmov 0  ;;  %v2098_v21 = vld [vmem:[#allocation6 + $0xb8] sm:$0xff]  }
  0x33   :  { %547 = vmatprep.subr.bf16.mxu0 %v2077_v39  ;;  %v2796_v23 = vsel %vm2383_vm12, 4294967295, %v2795_v23  ;;  %v103_v24 = vand.u32 7, %v53_v22  ;;  %v96_v27 = vand.u32 7, %v52_v25  ;;  %v50_v34 = vadd.s32 16, %v2276_v28 }
  0x34   :  { %v89_v33 = vand.u32 7, %v51_v29  ;;  %v2801_v35 = vmov 0  ;;  %v49_v39 = vadd.s32 8, %v2276_v28  ;;  %vm2757_vm1 = vmmov 0  }
  0x35   :  { %vm2393_vm13 = vcmp.eq.s32.totalorder %v103_v24, %v2280_v32  ;;  %vm2403_vm14 = vcmp.eq.s32.totalorder %v96_v27, %v2280_v32  ;;  %v82_v38 = vand.u32 7, %v50_v34  ;;  %1939 = vmatprep.mubr.msk.f32.mxu1 %vm2757_vm1, %v2206_v30  ;;  %vm2763_vm1 = vcmask 1040384  }
  0x36   :  { %548 = vmatpush1.bf16.msra.mxu0 %v2079_v40  ;;  %v2798_v26 = vsel %vm2393_vm13, 4294967295, %v2797_v26  ;;  %v2800_v31 = vsel %vm2403_vm14, 4294967295, %v2799_v31  ;;  %vm2413_vm15 = vcmp.eq.s32.totalorder %v89_v33, %v2280_v32  ;;  %v2803_v40 = vmov 0 }
  0x37   :  { %549 = vmatprep.subr.bf16.mxu0 %v2080_v41  ;;  %v2802_v35 = vsel %vm2413_vm15, 4294967295, %v2801_v35  ;;  %v75_v41 = vand.u32 7, %v49_v39  ;;  %v310_v18 = vand.u32 7, %v2280_v32  ;;  %v2810_v19 = vmov 0  ;;  %v2493_v39 = vld [vmem:[%s2751_s3] sm:$0xff]  ;;  %s2210_s3 = smov [#allocation8]  }
  0x38   :  { %s1660_s10 = sshll.u32 %s2210_s3, 4  ;;  %s1661_s10 = int_to_ptr.vmem [resolvable:$true] %s1660_s10 }
  0x39   :  { %vm2433_vm0 = vcmp.eq.s32.totalorder %v75_v41, %v2280_v32  ;;  %s2174_s11 = scalar_lea.vmem %s1661_s10, 512  ;;  %p2179_p11 = scmp.lt.s32.totalorder %s1661_s10, %s1661_s10 }
  0x3a   :  { %550 = vmatpush1.bf16.msra.mxu0 %v2082_v42  ;;  %v68_v42 = vand.u32 7, %v2276_v28  ;;  %p2175_p10 = scmp.ne.s32.totalorder %s1661_s10, %s2174_s11  ;;  %p2180_p12 = scmp.lt.s32.totalorder %s2174_s11, %s2174_s11 }
  0x3b   :  { %551 = vmatprep.subr.bf16.mxu0 %v2083_v43  ;;  %v2805_v43 = vmov 0 }
  0x3c   :  { %v2806_v43 = vsel %vm2433_vm0, 4294967295, %v2805_v43  ;;  %p2181_p13 = por %p2180_p12, %p2179_p11 }
  0x3e   :  { %552 = vmatpush1.bf16.msra.mxu0 %v2085_v44  ;;  %v2807_v44 = vmov 0  ;;  %p2182_p0 = pnand %p2181_p13, %p2175_p10 }
  0x3f   :  { %561 = vmatprep.subr.bf16.mxu0 %v2086_v45 }
  0x42   :  { %562 = vmatpush2.bf16.msra.mxu0 %v2088_v46 }
  0x43   :  { %563 = vmatprep.subr.bf16.mxu0 %v2089_v47 }
  0x46   :  { %564 = vmatpush2.bf16.msra.mxu0 %v2091_v48 }
  0x47   :  { %565 = vmatprep.subr.bf16.mxu0 %v2092_v49 }
  0x4a   :  { %566 = vmatpush2.bf16.msra.mxu0 %v2094_v50 }
  0x4b   :  { %567 = vmatprep.subr.bf16.mxu0 %v2095_v51 }
  0x4e   :  { %568 = vmatpush2.bf16.msra.mxu0 %v2097_v52 }
  0x4f   :  { %1947 = vmatprep.subr.bf16.mxu0 %v2098_v21 }
  0x97   :  { %v370_v55 = vpop.permute.xlu0 %369 }
  0x98   :  { %v382_v57 = vsel %vm380_vm2, %v2250_v0, %v370_v55  ;;  %v60_v0 = vadd.s32 96, %v2276_v28 }
  0x99   :  { %570 = vmatmul.mubr.bf16.vlgmr.msra.gmra.mxu0 %v382_v57 }
  0x9a   :  { %1719 = vmatprep.mubr.msk.bf16.mxu0 %vm380_vm2, %v379_v56  ;;  %v152_v3 = vand.u32 7, %v60_v0  ;;  %1948 = vmatpush3.bf16.msra.mxu0 %v2098_v21  ;;  %v2118_v21 = vld [vmem:[#allocation6 + $0x48] sm:$0xff]  }
  0x9b   :  { %v372_v58 = vpop.permute.xlu0 %371 }
  0x9c   :  { %v385_v59 = vsel %vm380_vm2, %v2258_v2, %v372_v58  ;;  %vm2323_vm6 = vcmp.eq.s32.totalorder %v152_v3, %v2280_v32  ;;  %vm2423_vm2 = vcmp.eq.s32.totalorder %v82_v38, %v2280_v32 }
  0x9d   :  { %1914 = vmatpush3.msk.msra.mxu1 %vm2323_vm6, %v2207_v37  ;;  %v2804_v40 = vsel %vm2423_vm2, 4294967295, %v2803_v40 }
  0x9e   :  { %1915 = vmatprep.subr.mxu1 %v2206_v30 }
  0x9f   :  { %1916 = vmatpush3.msk.msra.mxu1 %vm2333_vm7, %v2207_v37 }
  0xa0   :  { %1917 = vmatprep.subr.mxu1 %v2206_v30 }
  0xa1   :  { %580 = vmatmul.mubr.bf16.gmra.mxu0 %v385_v59  ;;  %1918 = vmatpush3.msk.msra.mxu1 %vm2343_vm8, %v2207_v37 }
  0xa2   :  { %1919 = vmatprep.subr.mxu1 %v2206_v30 }
  0xa3   :  { %1920 = vmatpush3.msk.msra.mxu1 %vm2353_vm9, %v2207_v37 }
  0xa4   :  { %1921 = vmatprep.subr.mxu1 %v2206_v30 }
  0xa5   :  { %1922 = vmatpush3.msk.msra.mxu1 %vm2363_vm10, %v2207_v37 }
  0xa6   :  { %1923 = vmatprep.subr.mxu1 %v2206_v30 }
  0xa7   :  { %1924 = vmatpush3.msk.msra.mxu1 %vm2373_vm11, %v2207_v37 }
  0xa8   :  { %1925 = vmatprep.subr.mxu1 %v2206_v30 }
  0xa9   :  { %1926 = vmatpush3.msk.msra.mxu1 %vm2383_vm12, %v2207_v37 }
  0xaa   :  { %1927 = vmatprep.subr.mxu1 %v2206_v30 }
  0xab   :  { %1928 = vmatpush3.msk.msra.mxu1 %vm2393_vm13, %v2207_v37 }
  0xac   :  { %1929 = vmatprep.subr.mxu1 %v2206_v30 }
  0xad   :  { %1930 = vmatpush3.msk.msra.mxu1 %vm2403_vm14, %v2207_v37  ;;  %vm859_vm14 = vsmask.f32 7938 }
  0xae   :  { %1931 = vmatprep.subr.mxu1 %v2206_v30 }
  0xaf   :  { %1932 = vmatpush3.msk.msra.mxu1 %vm2413_vm15, %v2207_v37  ;;  %vm2443_vm15 = vcmp.eq.s32.totalorder %v68_v42, %v2280_v32 }
  0xb0   :  { %1933 = vmatprep.subr.mxu1 %v2206_v30  ;;  %v2808_v44 = vsel %vm2443_vm15, 4294967295, %v2807_v44 }
  0xb1   :  { %1934 = vmatpush3.msk.msra.mxu1 %vm2423_vm2, %v2207_v37  ;;  %vm858_vm2 = vcmask 1043456  }
  0xb2   :  { %1935 = vmatprep.subr.mxu1 %v2206_v30  ;;  %vm2518_vm12 = vmand %vm858_vm2, %vm859_vm14 }
  0xb3   :  { %1936 = vmatpush3.msk.msra.mxu1 %vm2433_vm0, %v2207_v37  ;;  %vm2483_vm0 = vcmp.eq.s32.totalorder %v2276_v28, %v310_v18  ;;  %v2117_v18 = vld [vmem:[#allocation6 + $0x80] sm:$0xff]  }
  0xb4   :  { %1937 = vmatprep.subr.mxu1 %v2206_v30  ;;  %v2811_v19 = vsel %vm2483_vm0, 4294967295, %v2810_v19 }
  0xb5   :  { %1938 = vmatpush3.msk.msra.mxu1 %vm2443_vm15, %v2207_v37  ;;  %vm2809_vm15 = vmmov 0  }
  0xb6   :  { %1942 = vmatprep.subr.mxu1 %v2206_v30 }
 0x159   :  { %v2452_v45 = vpop.f32.mrf.mxu0 }
 0x15a   :  { %v599_v51 = vmul.f32 %v2452_v45, %v2452_v45 }
 0x15b   :  { %v2454_v46 = vpop.f32.mrf.mxu0 }
 0x15d   :  { %v2456_v47 = vpop.f32.mrf.mxu0 }
 0x15e   :  { %v600_v49 = vmul.f32 %v2456_v47, %v2456_v47  ;;  %v590_v52 = vadd.f32 %v2456_v47, %v2452_v45 }
 0x15f   :  { %v2458_v48 = vpop.f32.mrf.mxu0 }
 0x160   :  { %v603_v55 = vadd.f32 %v600_v49, %v599_v51 }
 0x161   :  { %v2462_v50 = vpop.f32.mrf.mxu0 }
 0x162   :  { %v601_v53 = vmul.f32 %v2462_v50, %v2462_v50  ;;  %v591_v56 = vadd.f32 %v590_v52, %v2462_v50 }
 0x163   :  { %v2470_v54 = vpop.f32.mrf.mxu0 }
 0x164   :  { %v604_v58 = vadd.f32 %v603_v55, %v601_v53  ;;  %v2099_v55 = vld [vmem:[#allocation6 + $0xb0] sm:$0xff]  }
 0x165   :  { %v2473_v57 = vpop.f32.mrf.mxu0  ;;  %1949 = vmatprep.subr.bf16.mxu0 %v2099_v55 }
 0x166   :  { %v592_v59 = vadd.f32 %v591_v56, %v2473_v57  ;;  %v602_v60 = vmul.f32 %v2473_v57, %v2473_v57  ;;  %v2100_v56 = vld [vmem:[#allocation6 + $0x78] sm:$0xff]   ;;  %1950 = vmatpush3.bf16.msra.mxu0 %v2099_v55 }
 0x168   :  { %v593_v61 = vrot.slane %v592_v59, 4  ;;  %v605_v62 = vadd.f32 %v604_v58, %v602_v60  ;;  %v2101_v58 = vld [vmem:[#allocation6 + $0x38] sm:$0xff]   ;;  %v2103_v60 = vld [vmem:[#allocation6 + $0x70] sm:$0xff]  }
 0x16a   :  { %v594_v1 = vadd.f32 %v593_v61, %v592_v59  ;;  %v606_v0 = vrot.slane %v605_v62, 4  ;;  %v2102_v59 = vld [vmem:[#allocation6 + $0xa8] sm:$0xff]   ;;  %v2209_v61 = vmov 0  }
 0x16b   :  { %799 = vst [vmem:[#allocation2] sm:$0xf] %v2209_v61  ;;  %800 = vst [vmem:[#allocation2 + $0x4] sm:$0xf] %v2209_v61  ;;  %1951 = vmatprep.subr.bf16.mxu0 %v2102_v59 }
 0x16c   :  { %v595_v3 = vrot.slane %v594_v1, 2  ;;  %v607_v4 = vadd.f32 %v606_v0, %v605_v62  ;;  %801 = vst [vmem:[#allocation2 + $0x8] sm:$0x1] %v2209_v61  ;;  %802 = vst [vmem:[#allocation2 + $0xc] sm:$0xf] %v2209_v61  ;;  %v2104_v62 = vld [vmem:[#allocation6 + $0x30] sm:$0xff]   ;;  %1952 = vmatpush3.bf16.msra.mxu0 %v2102_v59 }
 0x16d   :  { %803 = vst [vmem:[#allocation2 + $0x10] sm:$0xf] %v2209_v61  ;;  %804 = vst [vmem:[#allocation2 + $0x14] sm:$0x1] %v2209_v61  ;;  %v2106_v0 = vld [vmem:[#allocation6 + $0x68] sm:$0xff]  }
 0x16e   :  { %v596_v6 = vadd.f32 %v595_v3, %v594_v1  ;;  %v608_v7 = vrot.slane %v607_v4, 2  ;;  %v2105_v1 = vld [vmem:[#allocation6 + $0xa0] sm:$0xff]   ;;  %v2107_v3 = vld [vmem:[#allocation6 + $0x28] sm:$0xff]  }
 0x16f   :  { %1953 = vmatprep.subr.bf16.mxu0 %v2105_v1 }
 0x170   :  { %v597_v9 = vrot.slane %v596_v6, 1  ;;  %v609_v10 = vadd.f32 %v608_v7, %v607_v4  ;;  %1954 = vmatpush3.bf16.msra.mxu0 %v2105_v1  ;;  %v2108_v4 = vld [vmem:[#allocation6 + $0x98] sm:$0xff]   ;;  %v2110_v7 = vld [vmem:[#allocation6 + $0x20] sm:$0xff]  }
 0x171   :  { %1955 = vmatprep.subr.bf16.mxu0 %v2108_v4 }
 0x172   :  { %v610_v12 = vrot.slane %v609_v10, 1  ;;  %v598_v13 = vadd.f32 %v597_v9, %v596_v6  ;;  %v2109_v6 = vld [vmem:[#allocation6 + $0x60] sm:$0xff]   ;;  %v2111_v9 = vld [vmem:[#allocation6 + $0x90] sm:$0xff]  }
 0x174   :  { %v611_v15 = vadd.f32 %v610_v12, %v609_v10  ;;  %1956 = vmatpush3.bf16.msra.mxu0 %v2108_v4  ;;  %v2112_v10 = vld [vmem:[#allocation6 + $0x58] sm:$0xff]  }
 0x175   :  { %v2113_v12 = vld [vmem:[#allocation6 + $0x18] sm:$0xff]   ;;  %1957 = vmatprep.subr.bf16.mxu0 %v2111_v9 }
 0x176   :  { %v613_v16 = vsel %vm2763_vm1, %v598_v13, %v611_v15  ;;  %vm2766_vm1 = vcmask 64512   ;;  %v2114_v13 = vld [vmem:[#allocation6 + $0x88] sm:$0xff]   ;;  %v2115_v15 = vld [vmem:[#allocation6 + $0x50] sm:$0xff]  }
 0x177   :  { %1940 = vmatmul.mubr.f32.vlgmr.msra.gmra.mxu1 %v613_v16  ;;  %v2116_v16 = vld [vmem:[#allocation6 + $0x10] sm:$0xff]  }
 0x178   :  { %1944 = vmatprep.mubr.msk.f32.mxu1 %vm2809_vm15, %v2206_v30  ;;  %1943 = vmatpush3.msk.msra.mxu1 %vm2483_vm0, %v2207_v37  ;;  %vm2812_vm0 = vcmask 1040384  }
 0x179   :  { %1831 = vmatprep.subr.bf16.mxu1 %v2100_v56  ;;  %1958 = vmatpush3.bf16.msra.mxu0 %v2111_v9 }
 0x17a   :  { %1959 = vmatprep.subr.bf16.mxu0 %v2114_v13 }
 0x17d   :  { %1960 = vmatpush3.bf16.msra.mxu0 %v2114_v13 }
 0x17e   :  { %1961 = vmatprep.subr.bf16.mxu0 %v2117_v18 }
 0x181   :  { %1962 = vmatpush3.bf16.msra.mxu0 %v2117_v18 }
 0x182   :  { %2007 = vmatprep.subr.mxu0 %v2206_v30 }
 0x237   :  { %v680_v22 = vpop.f32.mrf.mxu1 }
 0x238   :  { %v684_v24 = vmul.f32 0.001953125, %v680_v22  ;;  %v2119_v22 = vld [vmem:[#allocation6 + $0x8] sm:$0xff]  }
 0x239   :  { %v1941_v25 = vpop.f32.mrf.mxu1 }
 0x23a   :  { %v685_v27 = vmul.f32 %v684_v24, %v684_v24  ;;  %v2126_v25 = vld [vmem:[#allocation6] sm:$0xff]  }
 0x23c   :  { %v687_v29 = vrot.slane %v685_v27, 7  ;;  %v2502_v27 = vsub.s32 0, %v2276_v28 }
 0x23e   :  { %v689_v33 = vsub.f32 %v684_v24, %v687_v29  ;;  %v2505_v29 = vsub.s32 1, %v2276_v28 }
 0x240   :  { %v690_v34 = vmax.f32 %v689_v33, 0.0 }
 0x242   :  { %v691_v32 = vadd.f32 1e-05, %v690_v34 }
 0x244   :  { %2128 = vrsqrt.f32 %v691_v32 }
 0x251   :  { %v2129_v38 = vpop.eup %2128 }
 0x252   :  { %v694_v41 = vrot.slane %v2129_v38, 1 }
 0x254   :  { %v696_v42 = vmul.f32 %v694_v41, %v2493_v39 }
 0x256   :  { %v697_v49 = vmul.f32 %v696_v42, %v684_v24  ;;  %v2123_v24 = vld [vmem:[#allocation6 + $0x40] sm:$0xff]  }
 0x258   :  { %v699_v51 = vrot.slane %v697_v49, 7 }
 0x25a   :  { %v701_v52 = vsub.f32 %v2493_v39, %v699_v51 }
 0x25c   :  { %v702_v53 = vsel %vm2812_vm0, %v696_v42, %v701_v52  ;;  %vm815_vm0 = vsmask.f32 256 }
 0x25d   :  { %1945 = vmatmul.mubr.msk.f32.vlgmr.msra.gmra.mxu1 %vm2766_vm1, %v702_v53  ;;  %vm816_vm1 = vsmask.f32 4368 }
 0x25e   :  { %1832 = vmatpush3.bf16.msra.mxu1 %v2101_v58  ;;  %vm2514_vm13 = vmor %vm815_vm0, %vm816_vm1  ;;  %vm2817_vm1 = vcmask 1040384  }
 0x25f   :  { %1833 = vmatprep.subr.bf16.mxu1 %v2103_v60  ;;  %vm2524_vm11 = vmand %vm2817_vm1, %vm815_vm0 }
 0x260   :  { %vm2832_vm2 = vmmov %vm2817_vm1 }
 0x261   :  { %vm2833_vm0 = vmmov %vm2817_vm1  ;;  %vm2834_vm1 = vnez %v2811_v19 }
 0x262   :  { %1834 = vmatpush3.bf16.msra.mxu1 %v2104_v62 }
 0x263   :  { %1835 = vmatprep.subr.bf16.mxu1 %v2106_v0 }
 0x266   :  { %1836 = vmatpush3.bf16.msra.mxu1 %v2107_v3 }
 0x267   :  { %1837 = vmatprep.subr.bf16.mxu1 %v2109_v6 }
 0x26a   :  { %1838 = vmatpush3.bf16.msra.mxu1 %v2110_v7 }
 0x26b   :  { %1839 = vmatprep.subr.bf16.mxu1 %v2112_v10  ;;  %v1451_v10 = vmul.f32 %v2470_v54, %v2470_v54 }
 0x26e   :  { %1840 = vmatpush3.bf16.msra.mxu1 %v2113_v12  ;;  %v861_v12 = vld [vmem:[#allocation2] sm:$0xf] }
 0x26f   :  { %1841 = vmatprep.subr.bf16.mxu1 %v2115_v15 }
 0x272   :  { %1842 = vmatpush3.bf16.msra.mxu1 %v2116_v16 }
 0x273   :  { %1843 = vmatprep.subr.bf16.mxu1 %v2118_v21 }
 0x276   :  { %1844 = vmatpush3.bf16.msra.mxu1 %v2119_v22  ;;  %v867_v22 = vld [vmem:[#allocation2 + $0x8] sm:$0x1] }
 0x277   :  { %1845 = vmatprep.subr.bf16.mxu1 %v2123_v24 }
 0x27a   :  { %1846 = vmatpush3.bf16.msra.mxu1 %v2126_v25 }
 0x27b   :  { %1967 = vmatprep.subr.mxu1 %v2206_v30 }
 0x31d   :  { %v773_v33 = vpop.f32.mrf.mxu1 }
 0x31e   :  { %v780_v34 = vrot.slane %v773_v33, %v2502_v27  ;;  %v788_v32 = vrot.slane %v773_v33, %v2505_v29 }
 0x31f   :  { %v1946_v38 = vpop.f32.mrf.mxu1 }
 0x320   :  { %v781_v41 = vmul.f32 %v780_v34, %v2452_v45  ;;  %v782_v42 = vmul.f32 %v780_v34, %v2456_v47  ;;  %v783_v49 = vmul.f32 %v780_v34, %v2462_v50  ;;  %v784_v51 = vmul.f32 %v780_v34, %v2473_v57  ;;  %v874_v38 = vld [vmem:[#allocation2 + $0x14] sm:$0x1] }
 0x322   :  { %v789_v52 = vadd.f32 %v788_v32, %v781_v41  ;;  %v790_v53 = vadd.f32 %v788_v32, %v782_v42  ;;  %v791_v55 = vadd.f32 %v788_v32, %v783_v49  ;;  %v792_v56 = vadd.f32 %v788_v32, %v784_v51  ;;  %v870_v32 = vld [vmem:[#allocation2 + $0xc] sm:$0xf] }
 0x324   :  { %v793_v28 = vmax.f32 %v789_v52, 0.0  ;;  %v794_v58 = vmax.f32 %v790_v53, 0.0  ;;  %v795_v59 = vmax.f32 %v791_v55, 0.0  ;;  %v796_v60 = vmax.f32 %v792_v56, 0.0 }
 0x326   :  { %v1808_v61 = vpack.c.bf16 %v793_v28, %v793_v28  ;;  %v1809_v62 = vpack.c.bf16 %v794_v58, %v794_v58  ;;  %v1810_v1 = vpack.c.bf16 %v795_v59, %v795_v59  ;;  %v1811_v45 = vpack.c.bf16 %v796_v60, %v796_v60 }
 0x328   :  { %v819_v47 = vshrl.u32 %v1808_v61, 16  ;;  %v827_v50 = vshrl.u32 %v1809_v62, 16  ;;  %v836_v0 = vshrl.u32 %v1810_v1, 16  ;;  %v844_v3 = vshrl.u32 %v1811_v45, 16 }
 0x329   :  { %v822_v6 = vshll.u32 %v1808_v61, 16  ;;  %v830_v9 = vshll.u32 %v1809_v62, 16  ;;  %v839_v15 = vshll.u32 %v1810_v1, 16  ;;  %v847_v18 = vshll.u32 %v1811_v45, 16 }
 0x32a   :  { %v821_v4 = vrot.slane %v819_v47, 7  ;;  %v829_v7 = vrot.slane %v827_v50, 7  ;;  %v838_v13 = vrot.slane %v836_v0, 7  ;;  %v846_v16 = vrot.slane %v844_v3, 7  ;;  %v2544_v3 = vpop.f32.mrf.mxu0 }
 0x32b   :  { %v1450_v45 = vmul.f32 %v2458_v48, %v2458_v48  ;;  %v1449_v0 = vmul.f32 %v2454_v46, %v2454_v46 }
 0x32c   :  { %v824_v24 = vor.u32 %v822_v6, %v821_v4  ;;  %v825_v25 = vrot.slane %v821_v4, 4  ;;  %v832_v33 = vor.u32 %v830_v9, %v829_v7  ;;  %v834_v34 = vrot.slane %v829_v7, 4 }
 0x32d   :  { %v841_v41 = vor.u32 %v839_v15, %v838_v13  ;;  %v842_v42 = vrot.slane %v838_v13, 4  ;;  %v849_v49 = vor.u32 %v847_v18, %v846_v16  ;;  %v851_v51 = vrot.slane %v846_v16, 4 }
 0x32e   :  { %v833_v52 = vsel %vm2514_vm13, %v825_v25, %v832_v33  ;;  %v862_v53 = vsel %vm2518_vm12, %v824_v24, %v861_v12  ;;  %v868_v55 = vsel %vm2524_vm11, %v834_v34, %v867_v22  ;;  %v1453_v25 = vadd.f32 %v1450_v45, %v1449_v0 }
 0x32f   :  { %v850_v56 = vsel %vm2514_vm13, %v842_v42, %v849_v49  ;;  %863 = vst [vmem:[#allocation2] sm:$0xf] %v862_v53  ;;  %864 = vst [vmem:[#allocation2 + $0x4] sm:$0xf] %v833_v52  ;;  %v871_v28 = vsel %vm2518_vm12, %v841_v41, %v870_v32  ;;  %v875_v58 = vsel %vm2524_vm11, %v851_v51, %v874_v38  ;;  %vm2820_vm11 = vcmask 1046528  }
 0x330   :  { %869 = vst [vmem:[#allocation2 + $0x8] sm:$0x1] %v868_v55  ;;  %872 = vst [vmem:[#allocation2 + $0xc] sm:$0xf] %v871_v28  ;;  %v1452_v33 = vmul.f32 %v2544_v3, %v2544_v3  ;;  %v1440_v51 = vadd.f32 %v2458_v48, %v2454_v46  ;;  %v1454_v52 = vadd.f32 %v1453_v25, %v1451_v10  ;;  %vm2822_vm13 = vsmask.f32 7424 }
 0x331   :  { %873 = vst [vmem:[#allocation2 + $0x10] sm:$0xf] %v850_v56  ;;  %876 = vst [vmem:[#allocation2 + $0x14] sm:$0x1] %v875_v58 }
 0x332   :  { %vm2821_vm12 = vmmov %vm2820_vm11  ;;  %v1441_v28 = vadd.f32 %v1440_v51, %v2470_v54  ;;  %v1455_v58 = vadd.f32 %v1454_v52, %v1452_v33 }
 0x333   :  { %vm2823_vm14 = vmmov %vm2822_vm13 }
 0x336   :  { %v877_v59 = vld [vmem:[#allocation2] sm:$0xf]  ;;  %v878_v60 = vld [vmem:[#allocation2 + $0x4] sm:$0xf] }
 0x337   :  { %v883_v61 = vld [vmem:[#allocation2] sm:$0xe]  ;;  %v1742_v62 = vcombine.low %v877_v59, %v878_v60  ;;  %v2121_v1 = vld [vmem:[#allocation2 + $0x8] ss:$0 sps:$4 sm:$0x11]  }
 0x338   :  { %v1746_v47 = vcombine.low %v883_v61, %v878_v60  ;;  %v880_v50 = vld [vmem:[#allocation2 + $0x10] sm:$0xf]  ;;  %v884_v57 = vld [vmem:[#allocation2 + $0xc] sm:$0xe]  ;;  %v936_v4 = vrot.slane %v2121_v1, 1  ;;  %v911_v15 = vshll.u32 %v2121_v1, 16  ;;  %v1442_v61 = vadd.f32 %v1441_v28, %v2544_v3 }
 0x339   :  { %v2124_v6 = vld [vmem:[#allocation2 + $0x14] ss:$0 sps:$4 sm:$0x11]   ;;  %v1747_v7 = vcombine.low %v884_v57, %v880_v50  ;;  %v906_v9 = vshll.u32 %v1742_v62, 16  ;;  %v904_v13 = vshrl.u32 %v1742_v62, 16 }
 0x33a   :  { %v935_v12 = vrot.slane %v1746_v47, 1  ;;  %v879_v16 = vld [vmem:[#allocation2 + $0xc] sm:$0xf]  ;;  %v939_v21 = vrot.slane %v2124_v6, 1  ;;  %v913_v32 = vrot.slane %v911_v15, 1  ;;  %v923_v49 = vshll.u32 %v2124_v6, 16 }
 0x33b   :  { %v938_v18 = vrot.slane %v1747_v7, 1  ;;  %v908_v22 = vrot.slane %v906_v9, 1  ;;  %v1743_v24 = vcombine.low %v879_v16, %v880_v50  ;;  %v1443_v36 = vrot.slane %v1442_v61, 4 }
 0x33c   :  { %v937_v34 = vsel %vm2820_vm11, %v935_v12, %v936_v4  ;;  %v925_v60 = vrot.slane %v923_v49, 1  ;;  %vm2835_vm11 = vmmov %vm2833_vm0 }
 0x33d   :  { %1963 = vmatprep.mubr.bf16.mxu0 %v937_v34  ;;  %v940_v38 = vsel %vm2821_vm12, %v938_v18, %v939_v21  ;;  %v909_v41 = vor.u32 %v908_v22, %v904_v13  ;;  %v918_v42 = vshll.u32 %v1743_v24, 16  ;;  %v916_v55 = vshrl.u32 %v1743_v24, 16 }
 0x33e   :  { %1964 = vmatmul.mubr.bf16.vlgmr.msra.gmra.mxu0 %v940_v38  ;;  %v1444_v63 = vadd.f32 %v1443_v36, %v1442_v61  ;;  %vm2836_vm12 = vcmask 64512  }
 0x33f   :  { %2008 = vmatpush3.msk.msra.mxu0 %vm2284_vm3, %v2207_v37  ;;  %v914_v53 = vsel %vm2822_vm13, %v909_v41, %v913_v32  ;;  %v920_v56 = vrot.slane %v918_v42, 1  ;;  %2039 = vmatprep.mubr.msk.f32.mxu0 %vm2809_vm15, %v2206_v30  ;;  %vm2837_vm13 = vmmov %vm2833_vm0 }
 0x340   :  { %2009 = vmatprep.subr.mxu0 %v2206_v30  ;;  %1167 = vmatprep.mubr.bf16.mxu1 %v914_v53  ;;  %v1445_v5 = vrot.slane %v1444_v63, 2 }
 0x341   :  { %2010 = vmatpush3.msk.msra.mxu0 %vm2303_vm4, %v2207_v37  ;;  %1168 = vmatmul.mubr.bf16.vlgmr.msra.gmra.mxu1 %v1742_v62  ;;  %v921_v59 = vor.u32 %v920_v56, %v916_v55  ;;  %v1456_v62 = vrot.slane %v1455_v58, 4 }
 0x342   :  { %2011 = vmatprep.subr.mxu0 %v2206_v30  ;;  %1968 = vmatpush3.msk.msra.mxu1 %vm2284_vm3, %v2207_v37  ;;  %vm2824_vm3 = vnez %v2794_v20  ;;  %v1446_v11 = vadd.f32 %v1445_v5, %v1444_v63 }
 0x343   :  { %2012 = vmatpush3.msk.msra.mxu0 %vm2313_vm5, %v2207_v37  ;;  %v926_v1 = vsel %vm2823_vm14, %v921_v59, %v925_v60  ;;  %1969 = vmatprep.subr.mxu1 %v2206_v30  ;;  %v1457_v45 = vadd.f32 %v1456_v62, %v1455_v58  ;;  %vm2838_vm14 = vmmov %vm2836_vm12 }
 0x344   :  { %1175 = vmatprep.mubr.bf16.mxu1 %v926_v1  ;;  %2013 = vmatprep.subr.mxu0 %v2206_v30  ;;  %v1447_v17 = vrot.slane %v1446_v11, 1 }
 0x345   :  { %2014 = vmatpush3.msk.msra.mxu0 %vm2323_vm6, %v2207_v37  ;;  %1970 = vmatpush3.msk.msra.mxu1 %vm2303_vm4, %v2207_v37  ;;  %v1458_v2 = vrot.slane %v1457_v45, 2  ;;  %vm2825_vm4 = vnez %v2796_v23 }
 0x346   :  { %2015 = vmatprep.subr.mxu0 %v2206_v30  ;;  %1971 = vmatprep.subr.mxu1 %v2206_v30  ;;  %v1448_v23 = vadd.f32 %v1447_v17, %v1446_v11 }
 0x347   :  { %2016 = vmatpush3.msk.msra.mxu0 %vm2333_vm7, %v2207_v37  ;;  %1972 = vmatpush3.msk.msra.mxu1 %vm2313_vm5, %v2207_v37  ;;  %v1459_v8 = vadd.f32 %v1458_v2, %v1457_v45  ;;  %vm2826_vm5 = vnez %v2798_v26 }
 0x348   :  { %2017 = vmatprep.subr.mxu0 %v2206_v30  ;;  %1973 = vmatprep.subr.mxu1 %v2206_v30 }
 0x349   :  { %2018 = vmatpush3.msk.msra.mxu0 %vm2343_vm8, %v2207_v37  ;;  %1176 = vmatmul.mubr.bf16.gmra.mxu1 %v1743_v24  ;;  %v1460_v14 = vrot.slane %v1459_v8, 1 }
 0x34a   :  { %2019 = vmatprep.subr.mxu0 %v2206_v30  ;;  %1974 = vmatpush3.msk.msra.mxu1 %vm2323_vm6, %v2207_v37  ;;  %vm2827_vm6 = vnez %v2800_v31 }
 0x34b   :  { %2020 = vmatpush3.msk.msra.mxu0 %vm2353_vm9, %v2207_v37  ;;  %1975 = vmatprep.subr.mxu1 %v2206_v30  ;;  %v1461_v20 = vadd.f32 %v1460_v14, %v1459_v8 }
 0x34c   :  { %2021 = vmatprep.subr.mxu0 %v2206_v30  ;;  %1976 = vmatpush3.msk.msra.mxu1 %vm2333_vm7, %v2207_v37  ;;  %vm2828_vm7 = vnez %v2802_v35 }
 0x34d   :  { %2022 = vmatpush3.msk.msra.mxu0 %vm2363_vm10, %v2207_v37  ;;  %1977 = vmatprep.subr.mxu1 %v2206_v30  ;;  %v1462_v26 = vsel %vm2832_vm2, %v1448_v23, %v1461_v20 }
 0x34e   :  { %2023 = vmatprep.subr.mxu0 %v2206_v30  ;;  %1978 = vmatpush3.msk.msra.mxu1 %vm2343_vm8, %v2207_v37  ;;  %vm2829_vm8 = vnez %v2804_v40 }
 0x34f   :  { %2024 = vmatpush3.msk.msra.mxu0 %vm2824_vm3, %v2207_v37  ;;  %1979 = vmatprep.subr.mxu1 %v2206_v30 }
 0x350   :  { %2025 = vmatprep.subr.mxu0 %v2206_v30  ;;  %1980 = vmatpush3.msk.msra.mxu1 %vm2353_vm9, %v2207_v37  ;;  %vm2830_vm9 = vnez %v2806_v43 }
 0x351   :  { %2026 = vmatpush3.msk.msra.mxu0 %vm2825_vm4, %v2207_v37  ;;  %1981 = vmatprep.subr.mxu1 %v2206_v30 }
 0x352   :  { %2027 = vmatprep.subr.mxu0 %v2206_v30  ;;  %1982 = vmatpush3.msk.msra.mxu1 %vm2363_vm10, %v2207_v37  ;;  %vm2831_vm10 = vnez %v2808_v44 }
 0x353   :  { %2028 = vmatpush3.msk.msra.mxu0 %vm2826_vm5, %v2207_v37  ;;  %1983 = vmatprep.subr.mxu1 %v2206_v30 }
 0x354   :  { %2029 = vmatprep.subr.mxu0 %v2206_v30  ;;  %1984 = vmatpush3.msk.msra.mxu1 %vm2824_vm3, %v2207_v37 }
 0x355   :  { %2030 = vmatpush3.msk.msra.mxu0 %vm2827_vm6, %v2207_v37  ;;  %1985 = vmatprep.subr.mxu1 %v2206_v30 }
 0x356   :  { %2031 = vmatprep.subr.mxu0 %v2206_v30  ;;  %1986 = vmatpush3.msk.msra.mxu1 %vm2825_vm4, %v2207_v37 }
 0x357   :  { %2032 = vmatpush3.msk.msra.mxu0 %vm2828_vm7, %v2207_v37  ;;  %1987 = vmatprep.subr.mxu1 %v2206_v30 }
 0x358   :  { %2033 = vmatprep.subr.mxu0 %v2206_v30  ;;  %1988 = vmatpush3.msk.msra.mxu1 %vm2826_vm5, %v2207_v37 }
 0x359   :  { %2034 = vmatpush3.msk.msra.mxu0 %vm2829_vm8, %v2207_v37  ;;  %1989 = vmatprep.subr.mxu1 %v2206_v30 }
 0x35a   :  { %2035 = vmatprep.subr.mxu0 %v2206_v30  ;;  %1990 = vmatpush3.msk.msra.mxu1 %vm2827_vm6, %v2207_v37 }
 0x35b   :  { %2036 = vmatpush3.msk.msra.mxu0 %vm2830_vm9, %v2207_v37  ;;  %1991 = vmatprep.subr.mxu1 %v2206_v30 }
 0x35c   :  { %2037 = vmatprep.subr.mxu0 %v2206_v30  ;;  %1992 = vmatpush3.msk.msra.mxu1 %vm2828_vm7, %v2207_v37 }
 0x35d   :  { %2038 = vmatpush3.msk.msra.mxu0 %vm2831_vm10, %v2207_v37  ;;  %1993 = vmatprep.subr.mxu1 %v2206_v30 }
 0x35e   :  { %2040 = vmatmul.mubr.f32.vlgmr.msra.gmra.mxu0 %v1462_v26  ;;  %1994 = vmatpush3.msk.msra.mxu1 %vm2829_vm8, %v2207_v37 }
 0x35f   :  { %1995 = vmatprep.subr.mxu1 %v2206_v30  ;;  %1999 = vmatprep.mubr.msk.f32.mxu1 %vm2809_vm15, %v2206_v30 }
 0x360   :  { %1996 = vmatpush3.msk.msra.mxu1 %vm2830_vm9, %v2207_v37 }
 0x361   :  { %1997 = vmatprep.subr.mxu1 %v2206_v30 }
 0x362   :  { %1998 = vmatpush3.msk.msra.mxu1 %vm2831_vm10, %v2207_v37 }
 0x363   :  { %2002 = vmatprep.subr.mxu1 %v2206_v30 }
 0x3fe   :  { %v1965_v31 = vpop.f32.mrf.mxu0 }
 0x400   :  { %v1218_v35 = vpop.f32.mrf.mxu0 }
 0x401   :  { %v1847_v40 = vpop.f32.mrf.mxu1 }
 0x402   :  { %v1966_v50 = vpop.f32.mrf.mxu0 }
 0x403   :  { %v1848_v47 = vpop.f32.mrf.mxu1 }
 0x404   :  { %v1849_v4 = vadd.f32 %v1848_v47, %v1847_v40  ;;  %v1221_v7 = vpop.f32.mrf.mxu0 }
 0x405   :  { %v1850_v57 = vpop.f32.mrf.mxu1 }
 0x406   :  { %v2692_v12 = vadd.f32 %v1849_v4, %v1218_v35 }
 0x407   :  { %v1851_v0 = vpop.f32.mrf.mxu1 }
 0x408   :  { %v1852_v6 = vadd.f32 %v1851_v0, %v1850_v57  ;;  %v1242_v21 = vmul.f32 %v2692_v12, %v2692_v12 }
 0x409   :  { %v1853_v43 = vpop.f32.mrf.mxu1 }
 0x40a   :  { %v2690_v9 = vadd.f32 %v1852_v6, %v1221_v7 }
 0x40b   :  { %v1854_v10 = vpop.f32.mrf.mxu1 }
 0x40c   :  { %v1855_v44 = vadd.f32 %v1854_v10, %v1853_v43  ;;  %v1243_v15 = vmul.f32 %v2690_v9, %v2690_v9  ;;  %v1233_v22 = vadd.f32 %v2690_v9, %v2692_v12 }
 0x40d   :  { %v1856_v13 = vpop.f32.mrf.mxu1 }
 0x40e   :  { %v2696_v16 = vadd.f32 %v1965_v31, %v1855_v44  ;;  %v1246_v33 = vadd.f32 %v1243_v15, %v1242_v21 }
 0x40f   :  { %v1857_v18 = vpop.f32.mrf.mxu1 }
 0x410   :  { %v1244_v24 = vmul.f32 %v2696_v16, %v2696_v16  ;;  %v1858_v25 = vadd.f32 %v1857_v18, %v1856_v13  ;;  %v1234_v34 = vadd.f32 %v1233_v22, %v2696_v16 }
 0x412   :  { %v2705_v32 = vadd.f32 %v1966_v50, %v1858_v25  ;;  %v1247_v38 = vadd.f32 %v1246_v33, %v1244_v24 }
 0x414   :  { %v1235_v41 = vadd.f32 %v1234_v34, %v2705_v32  ;;  %v1245_v42 = vmul.f32 %v2705_v32, %v2705_v32 }
 0x416   :  { %v1236_v49 = vrot.slane %v1235_v41, 4  ;;  %v1248_v51 = vadd.f32 %v1247_v38, %v1245_v42 }
 0x418   :  { %v1237_v52 = vadd.f32 %v1236_v49, %v1235_v41  ;;  %v1249_v53 = vrot.slane %v1248_v51, 4 }
 0x41a   :  { %v1238_v55 = vrot.slane %v1237_v52, 2  ;;  %v1250_v56 = vadd.f32 %v1249_v53, %v1248_v51 }
 0x41c   :  { %v1239_v28 = vadd.f32 %v1238_v55, %v1237_v52  ;;  %v1251_v58 = vrot.slane %v1250_v56, 2 }
 0x41e   :  { %v1529_v59 = vpop.f32.mrf.mxu0  ;;  %v1240_v60 = vrot.slane %v1239_v28, 1  ;;  %v1252_v61 = vadd.f32 %v1251_v58, %v1250_v56 }
 0x41f   :  { %v1533_v2 = vmul.f32 0.001953125, %v1529_v59 }
 0x420   :  { %v2041_v1 = vpop.f32.mrf.mxu0  ;;  %v1253_v62 = vrot.slane %v1252_v61, 1  ;;  %v1241_v36 = vadd.f32 %v1240_v60, %v1239_v28 }
 0x421   :  { %v1534_v5 = vmul.f32 %v1533_v2, %v1533_v2 }
 0x422   :  { %v1254_v45 = vadd.f32 %v1253_v62, %v1252_v61 }
 0x423   :  { %v1536_v8 = vrot.slane %v1534_v5, 7 }
 0x424   :  { %v1255_v63 = vsel %vm2833_vm0, %v1241_v36, %v1254_v45 }
 0x425   :  { %2000 = vmatmul.mubr.f32.vlgmr.msra.gmra.mxu1 %v1255_v63  ;;  %v1538_v11 = vsub.f32 %v1533_v2, %v1536_v8 }
 0x426   :  { %2003 = vmatpush3.msk.msra.mxu1 %vm2834_vm1, %v2207_v37  ;;  %2004 = vmatprep.mubr.msk.f32.mxu1 %vm2809_vm15, %v2206_v30 }
 0x427   :  { %2042 = vmatprep.subr.mxu1 %v2206_v30  ;;  %v1539_v14 = vmax.f32 %v1538_v11, 0.0 }
 0x429   :  { %v1540_v17 = vadd.f32 1e-05, %v1539_v14 }
 0x42b   :  { %2130 = vrsqrt.f32 %v1540_v17 }
 0x438   :  { %v2131_v57 = vpop.eup %2130 }
 0x439   :  { %v1543_v0 = vrot.slane %v2131_v57, 5 }
 0x43b   :  { %v1545_v4 = vmul.f32 %v1543_v0, %v2493_v39 }
 0x43d   :  { %v1547_v6 = vrot.slane %v1545_v4, 4 }
 0x43f   :  { %v1549_v10 = vmul.f32 %v1547_v6, %v1533_v2 }
 0x441   :  { %v1551_v15 = vrot.slane %v1549_v10, 3 }
 0x443   :  { %v1553_v22 = vsub.f32 %v2493_v39, %v1551_v15 }
 0x445   :  { %v1555_v33 = vrot.slane %v1553_v22, 4 }
 0x447   :  { %v1557_v38 = vsel %vm2837_vm13, %v1547_v6, %v1555_v33 }
 0x4e5   :  { %v1322_v20 = vpop.f32.mrf.mxu1 }
 0x4e6   :  { %v1326_v23 = vmul.f32 0.001953125, %v1322_v20 }
 0x4e7   :  { %v2001_v26 = vpop.f32.mrf.mxu1 }
 0x4e8   :  { %v1327_v31 = vmul.f32 %v1326_v23, %v1326_v23 }
 0x4ea   :  { %v1329_v35 = vrot.slane %v1327_v31, 7 }
 0x4ec   :  { %v1331_v40 = vsub.f32 %v1326_v23, %v1329_v35 }
 0x4ee   :  { %v1332_v47 = vmax.f32 %v1331_v40, 0.0 }
 0x4f0   :  { %v1333_v50 = vadd.f32 1e-05, %v1332_v47 }
 0x4f2   :  { %2132 = vrsqrt.f32 %v1333_v50 }
 0x4ff   :  { %v2133_v7 = vpop.eup %2132 }
 0x500   :  { %v1336_v43 = vrot.slane %v2133_v7, 7 }
 0x502   :  { %v1338_v44 = vmul.f32 %v1336_v43, %v2493_v39 }
 0x504   :  { %v1340_v13 = vrot.slane %v1338_v44, 2 }
 0x506   :  { %v1342_v18 = vmul.f32 %v1340_v13, %v1326_v23 }
 0x508   :  { %v1344_v21 = vrot.slane %v1342_v18, 5 }
 0x50a   :  { %v1346_v24 = vsub.f32 %v2493_v39, %v1344_v21 }
 0x50c   :  { %v1348_v25 = vrot.slane %v1346_v24, 2 }
 0x50e   :  { %v1350_v34 = vsel %vm2835_vm11, %v1340_v13, %v1348_v25 }
 0x50f   :  { %2005 = vmatmul.mubr.msk.f32.vlgmr.msra.gmra.mxu1 %vm2836_vm12, %v1350_v34 }
 0x510   :  { %2043 = vmatpush3.msk.msra.mxu1 %vm2834_vm1, %v2207_v37  ;;  %2044 = vmatprep.mubr.msk.f32.mxu1 %vm2809_vm15, %v2206_v30 }
 0x513   :  { %2045 = vmatmul.mubr.msk.f32.vlgmr.msra.gmra.mxu1 %vm2838_vm14, %v1557_v38 }
 0x5cf   :  { %v1420_v41 = vpop.f32.mrf.mxu1 }
 0x5d0   :  { %v1427_v39 = vrot.slane %v1420_v41, %v2502_v27  ;;  %v1435_v55 = vrot.slane %v1420_v41, %v2505_v29 }
 0x5d1   :  { %v2006_v42 = vpop.f32.mrf.mxu1 }
 0x5d2   :  { %v1428_v51 = vmul.f32 %v1427_v39, %v2692_v12  ;;  %v1429_v52 = vmul.f32 %v1427_v39, %v2690_v9  ;;  %v1430_v53 = vmul.f32 %v1427_v39, %v2696_v16  ;;  %v1431_v37 = vmul.f32 %v1427_v39, %v2705_v32 }
 0x5d3   :  { %v1627_v49 = vpop.f32.mrf.mxu1 }
 0x5d4   :  { %v1634_v19 = vrot.slane %v1627_v49, %v2502_v27  ;;  %v1642_v56 = vrot.slane %v1627_v49, %v2505_v29  ;;  %v1436_v9 = vadd.f32 %v1435_v55, %v1428_v51  ;;  %v1437_v60 = vadd.f32 %v1435_v55, %v1429_v52 }
 0x5d5   :  { %v2046_v30 = vpop.f32.mrf.mxu1  ;;  %v1438_v16 = vadd.f32 %v1435_v55, %v1430_v53  ;;  %v1439_v61 = vadd.f32 %v1435_v55, %v1431_v37 }
 0x5d6   :  { %v1635_v28 = vmul.f32 %v1634_v19, %v2454_v46  ;;  %v1636_v58 = vmul.f32 %v1634_v19, %v2458_v48  ;;  %v1637_v59 = vmul.f32 %v1634_v19, %v2470_v54  ;;  %v1638_v12 = vmul.f32 %v1634_v19, %v2544_v3 }
 0x5d8   :  { %v1643_v27 = vadd.f32 %v1642_v56, %v1635_v28  ;;  %v1644_v32 = vadd.f32 %v1642_v56, %v1636_v58  ;;  %v1645_v1 = vadd.f32 %v1642_v56, %v1637_v59  ;;  %v1646_v62 = vadd.f32 %v1642_v56, %v1638_v12 }
 0x5da   :  { %v1647_v36 = vadd.f32 %v1643_v27, %v1436_v9  ;;  %v1648_v29 = vadd.f32 %v1644_v32, %v1437_v60  ;;  %v1649_v45 = vadd.f32 %v1645_v1, %v1438_v16  ;;  %v1650_v46 = vadd.f32 %v1646_v62, %v1439_v61 }
 0x5dc   :  { %1651 = vst [vmem:[#allocation8] sm:$0xff] %v1647_v36  ;;  %1652 = vst [vmem:[#allocation8 + $0x8] sm:$0xff] %v1648_v29 }
 0x5dd   :  { %1653 = vst [vmem:[#allocation8 + $0x10] sm:$0xff] %v1649_v45  ;;  %1654 = vst [vmem:[#allocation8 + $0x18] sm:$0xff] %v1650_v46 }
 0x5de   :  { %2185 = shalt.err (!%p2182_p0)
}
 0x5df   :  { %1666 = dma.vmem_to_hbm [thread:$0]  %s1661_s10, 512, %s2752_s4, [#allocation5], %s2201_s18, %s2201_s18, %s2202_s19  }
 0x5e0   :  { %2198 = dma.done.wait [#allocation5], 512  }
 0x5e1   :  { %2199 = vsyncadd [#allocation5], 4294966784 }
 0x5e2   :  { %1670 = vsyncpa [#allocation4], 1 }
 0x5e3   :  { %1671 = vsyncpa [#allocation7], 1 }
 0x5e4   :  { %1672 = vsyncpa [#allocation5], 1 }

</bundles_post_ra>
